<compile_context>
chip_gen: v7x
topology: tpu7x:2x2x1
jax: 0.10.0
libtpu: 0.0.40
codegen_flags: <defaults>
</compile_context>

<pallas_src>
import jax
import jax.numpy as jnp
from jax import lax
from jax.experimental import pallas as pl
from jax.experimental.pallas import tpu as pltpu

BN_EPS = 1e-5  # nn.BatchNorm1d default


def word_encoder_kernel(
    sidx_ref,                          # VMEM (BB, T_sub) int32 subword -> word ids
    h1_ref, h2_ref, h3_ref, h4_ref,    # VMEM (BB, T_sub, D) bf16 last-4 BERT hidden states
    wfold_ref,                         # VMEM (D, P) f32 projection weight with BN scale folded in
    bias_ref,                          # VMEM (1, P) f32 BN shift folded through the projection
    out_ref,                           # VMEM (BB, W-1, P) f32
):
    bb, t_sub, d = h1_ref.shape
    w_m1 = out_ref.shape[1]            # number of kept words (word 0 dropped)
    p = out_ref.shape[2]

    # --- 1) sum of the last 4 hidden states (full-tile VPU adds in f32) ---
    # The 0.25 mixing factor is folded into the per-word reciprocal below.
    h_sum = (h1_ref[...].astype(jnp.float32) + h2_ref[...].astype(jnp.float32)
             + h3_ref[...].astype(jnp.float32) + h4_ref[...].astype(jnp.float32))

    # --- 2)+3) scatter_mean(dim=1) restricted to words 1..W-1 as a one-hot
    #           segment matmul on the MXU (word 0 / OOB ids give zero columns).
    sidx = sidx_ref[...]                                               # (BB, T_sub)
    tgt = lax.broadcasted_iota(jnp.int32, (bb, w_m1, t_sub), 1) + 1    # word ids 1..W-1
    one_hot = (sidx[:, None, :] == tgt).astype(jnp.float32)            # (BB, W-1, T_sub)
    seg_sum = jnp.einsum('bwt,btd->bwd', one_hot, h_sum,
                         preferred_element_type=jnp.float32)           # (BB, W-1, D)
    cnt = jnp.sum(one_hot, axis=2, keepdims=True)                      # (BB, W-1, 1)
    inv = 0.25 * pl.reciprocal(jnp.maximum(cnt, 1.0), approx=True)     # mean + 0.25 mix (EUP)
    word_emb = seg_sum * inv                                           # (BB, W-1, D)

    # TODO(synk): nn.Dropout is identity in inference mode; no RNG masking applied here.

    # --- 4)+5) BatchNorm1d (eval) folded into wfold/bias; one fat MXU matmul ---
    x2 = word_emb.reshape(bb * w_m1, d)                                # (BB*(W-1), D)
    y = jnp.dot(x2, wfold_ref[...],
                preferred_element_type=jnp.float32) + bias_ref[...]    # (BB*(W-1), P)

    # --- 6) SiLU gating ---
    y = y * jax.nn.sigmoid(y)

    out_ref[...] = y.reshape(bb, w_m1, p).astype(out_ref.dtype)


def word_encoder(hidden_states, subword_indices, gamma, beta, rmean, rvar,
                 w_proj, num_words, *, batch_block=None):
    """hidden_states: tuple of 4 arrays (B, T_sub, D). Returns (B, num_words-1, P)."""
    h1, h2, h3, h4 = hidden_states
    B, T_sub, D = h1.shape
    P = w_proj.shape[1]
    W = num_words

    # Batches processed per grid step. bb == B (default) keeps the (bb, T_sub)
    # int32 index block equal to its full array dims (satisfies the (8,128) rule).
    bb = B if batch_block is None else batch_block
    assert B % bb == 0, "batch size must be divisible by the batch block"
    grid = (B // bb,)

    # HBM-bound kernel: feed the hidden states as bf16 (half the DMA bytes);
    # the kernel upcasts to f32 before the adds.
    h1, h2, h3, h4 = (h.astype(jnp.bfloat16) for h in (h1, h2, h3, h4))
    sidx = subword_indices.astype(jnp.int32)

    # Fold the eval-mode BatchNorm1d affine into the bias-free projection:
    #   (x * scale + shift) @ Wp == x @ (scale[:, None] * Wp) + shift @ Wp
    scale = gamma * lax.rsqrt(rvar + BN_EPS)                        # (1, D)
    shift = beta - rmean * scale                                    # (1, D)
    w_fold = (scale.reshape(D, 1) * w_proj).astype(jnp.float32)     # (D, P)
    bias = (shift.reshape(1, D) @ w_proj).astype(jnp.float32)       # (1, P)

    h_spec = pl.BlockSpec((bb, T_sub, D), lambda i: (i, 0, 0))
    grid_spec = pltpu.PrefetchScalarGridSpec(
        num_scalar_prefetch=0,
        grid=grid,
        in_specs=[pl.BlockSpec((bb, T_sub), lambda i: (i, 0)),
                  h_spec, h_spec, h_spec, h_spec,
                  # constant index_map -> weight / bias stay resident across steps
                  pl.BlockSpec((D, P), lambda i: (0, 0)),
                  pl.BlockSpec((1, P), lambda i: (0, 0))],
        out_specs=pl.BlockSpec((bb, W - 1, P), lambda i: (i, 0, 0)),
    )

    return pl.pallas_call(
        word_encoder_kernel,
        out_shape=jax.ShapeDtypeStruct((B, W - 1, P), jnp.float32),
        grid_spec=grid_spec,
        compiler_params=pltpu.CompilerParams(
            # batch steps are fully independent -> shard across v7x's 2 TensorCores
            dimension_semantics=("parallel",)),
    )(sidx, h1, h2, h3, h4, w_fold, bias)


def reference(hidden_states, subword_indices, gamma, beta, rmean, rvar, w_proj, num_words):
    h1, h2, h3, h4 = hidden_states
    avg = 0.25 * (h1 + h2 + h3 + h4)
    B, T_sub, D = avg.shape

    def per_batch(a, s):
        seg_sum = jax.ops.segment_sum(a, s, num_segments=num_words)
        cnt = jax.ops.segment_sum(jnp.ones((T_sub,), jnp.float32), s, num_segments=num_words)
        return seg_sum / jnp.maximum(cnt, 1.0)[:, None]

    mean = jax.vmap(per_batch)(avg, subword_indices)
    x = mean[:, 1:, :]
    scale = gamma * lax.rsqrt(rvar + BN_EPS)
    shift = beta - rmean * scale
    xn = x * scale + shift
    y = xn @ w_proj
    return y * jax.nn.sigmoid(y)


if __name__ == "__main__":
    B, T_SUB, D, W, P = 2, 16, 768, 8, 256   # 'base' model -> 768-dim embeddings

    key = jax.random.PRNGKey(0)
    k1, k2, k3, k4, kw = jax.random.split(key, 5)
    h1 = jax.random.normal(k1, (B, T_SUB, D), jnp.float32)
    h2 = jax.random.normal(k2, (B, T_SUB, D), jnp.float32)
    h3 = jax.random.normal(k3, (B, T_SUB, D), jnp.float32)
    h4 = jax.random.normal(k4, (B, T_SUB, D), jnp.float32)

    # Each word owns two consecutive subword tokens (word 0 plays the [CLS] slot).
    subword_indices = jnp.tile(jnp.repeat(jnp.arange(W, dtype=jnp.int32), 2)[None, :], (B, 1))

    # Deterministic BatchNorm parameters / running statistics, shaped (1, D).
    ch = jnp.arange(D, dtype=jnp.float32)
    gamma = (1.0 + 0.001 * ch)[None, :]
    beta = (0.01 * jnp.sin(ch))[None, :]
    rmean = (0.05 * jnp.cos(ch))[None, :]
    rvar = (1.0 + 0.002 * ch)[None, :]

    # Projection weight: nn.Linear(D, P, bias=False) stores (P, D); we pass its transpose.
    w_proj = jax.random.normal(kw, (D, P), jnp.float32) * (1.0 / jnp.sqrt(jnp.float32(D)))

    hs = (h1, h2, h3, h4)
    out = word_encoder(hs, subword_indices, gamma, beta, rmean, rvar, w_proj, W)
    out = jax.block_until_ready(out)

    ref = reference(hs, subword_indices, gamma, beta, rmean, rvar, w_proj, W)
    assert out.shape == (B, W - 1, P)
    assert jnp.allclose(out, ref, rtol=2e-2, atol=2e-2), "mismatch vs pure-JAX reference"

    print("KERNEL_OK")
</pallas_src>

<mosaic_0001>
module attributes {stable_mosaic.version = 11 : i64} {
  func.func @word_encoder_kernel(%arg0: i32, %arg1: memref<2x16xi32, #tpu.memory_space<vmem>>, %arg2: memref<2x16x768xbf16, #tpu.memory_space<vmem>>, %arg3: memref<2x16x768xbf16, #tpu.memory_space<vmem>>, %arg4: memref<2x16x768xbf16, #tpu.memory_space<vmem>>, %arg5: memref<2x16x768xbf16, #tpu.memory_space<vmem>>, %arg6: memref<768x256xf32, #tpu.memory_space<vmem>>, %arg7: memref<1x256xf32, #tpu.memory_space<vmem>>, %arg8: memref<2x7x256xf32, #tpu.memory_space<vmem>>) attributes {dimension_semantics = [#tpu.dimension_semantics<parallel>], iteration_bounds = array<i64: 1>, scalar_prefetch = 0 : i64, scratch_operands = 0 : i64, tpu.core_type = #tpu.core_type<tc>, window_params = [{transform_indices = @transform_0, window_bounds = array<i64: 2, 16>}, {transform_indices = @transform_1, window_bounds = array<i64: 2, 16, 768>}, {transform_indices = @transform_2, window_bounds = array<i64: 2, 16, 768>}, {transform_indices = @transform_3, window_bounds = array<i64: 2, 16, 768>}, {transform_indices = @transform_4, window_bounds = array<i64: 2, 16, 768>}, {pipeline_mode = #tpu.pipeline_mode<synchronous>, transform_indices = @transform_5, window_bounds = array<i64: 768, 256>}, {pipeline_mode = #tpu.pipeline_mode<synchronous>, transform_indices = @transform_6, window_bounds = array<i64: 1, 256>}, {transform_indices = @transform_7, window_bounds = array<i64: 2, 7, 256>}]} {
    %c0 = arith.constant 0 : index
    %c0_0 = arith.constant 0 : index
    %c0_1 = arith.constant 0 : index
    %0 = vector.load %arg2[%c0, %c0_0, %c0_1] : memref<2x16x768xbf16, #tpu.memory_space<vmem>>, vector<2x16x768xbf16>
    %1 = arith.extf %0 : vector<2x16x768xbf16> to vector<2x16x768xf32>
    %c0_2 = arith.constant 0 : index
    %c0_3 = arith.constant 0 : index
    %c0_4 = arith.constant 0 : index
    %2 = vector.load %arg3[%c0_2, %c0_3, %c0_4] : memref<2x16x768xbf16, #tpu.memory_space<vmem>>, vector<2x16x768xbf16>
    %3 = arith.extf %2 : vector<2x16x768xbf16> to vector<2x16x768xf32>
    %4 = arith.addf %1, %3 : vector<2x16x768xf32>
    %c0_5 = arith.constant 0 : index
    %c0_6 = arith.constant 0 : index
    %c0_7 = arith.constant 0 : index
    %5 = vector.load %arg4[%c0_5, %c0_6, %c0_7] : memref<2x16x768xbf16, #tpu.memory_space<vmem>>, vector<2x16x768xbf16>
    %6 = arith.extf %5 : vector<2x16x768xbf16> to vector<2x16x768xf32>
    %7 = arith.addf %4, %6 : vector<2x16x768xf32>
    %c0_8 = arith.constant 0 : index
    %c0_9 = arith.constant 0 : index
    %c0_10 = arith.constant 0 : index
    %8 = vector.load %arg5[%c0_8, %c0_9, %c0_10] : memref<2x16x768xbf16, #tpu.memory_space<vmem>>, vector<2x16x768xbf16>
    %9 = arith.extf %8 : vector<2x16x768xbf16> to vector<2x16x768xf32>
    %10 = arith.addf %7, %9 : vector<2x16x768xf32>
    %c0_11 = arith.constant 0 : index
    %c0_12 = arith.constant 0 : index
    %11 = vector.load %arg1[%c0_11, %c0_12] : memref<2x16xi32, #tpu.memory_space<vmem>>, vector<2x16xi32>
    %12 = tpu.iota {dimensions = array<i32: 1>} : vector<2x7x16xi32>
    %c1_i32 = arith.constant 1 : i32
    %13 = vector.broadcast %c1_i32 : i32 to vector<2x7x16xi32>
    %14 = arith.addi %12, %13 : vector<2x7x16xi32>
    %15 = vector.shape_cast %11 : vector<2x16xi32> to vector<2x1x16xi32>
    %16 = vector.broadcast %15 : vector<2x1x16xi32> to vector<2x7x16xi32>
    %17 = arith.cmpi eq, %16, %14 : vector<2x7x16xi32>
    %18 = arith.extui %17 : vector<2x7x16xi1> to vector<2x7x16xi32>
    %19 = arith.sitofp %18 : vector<2x7x16xi32> to vector<2x7x16xf32>
    "tpu.trace_start"() <{level = 10 : i32, message = "bwt,btd->bwd"}> : () -> ()
    %cst = arith.constant dense<0.000000e+00> : vector<2x7x768xf32>
    %20 = tpu.matmul %19, %10, %cst {dimension_numbers = #tpu.dot_dimension_numbers<[2], [1], [1], [2], [0, 0, 0, 1, 1, 2], [0], [0]>} : vector<2x7x16xf32>, vector<2x16x768xf32>, vector<2x7x768xf32> -> vector<2x7x768xf32>
    "tpu.trace_stop"() : () -> ()
    %cst_13 = arith.constant dense<0.000000e+00> : vector<2x7xf32>
    %21 = vector.multi_reduction <add>, %19, %cst_13 [2] : vector<2x7x16xf32> to vector<2x7xf32>
    %22 = vector.shape_cast %21 : vector<2x7xf32> to vector<2x7x1xf32>
    %cst_14 = arith.constant 1.000000e+00 : f32
    %23 = vector.broadcast %cst_14 : f32 to vector<2x7x1xf32>
    %24 = arith.maximumf %22, %23 : vector<2x7x1xf32>
    %25 = tpu.reciprocal %24 {approx = true} : vector<2x7x1xf32> -> vector<2x7x1xf32>
    %cst_15 = arith.constant 2.500000e-01 : f32
    %26 = vector.broadcast %cst_15 : f32 to vector<2x7x1xf32>
    %27 = arith.mulf %26, %25 : vector<2x7x1xf32>
    %28 = vector.broadcast %27 : vector<2x7x1xf32> to vector<2x7x768xf32>
    %29 = arith.mulf %20, %28 : vector<2x7x768xf32>
    %30 = vector.shape_cast %29 : vector<2x7x768xf32> to vector<14x768xf32>
    %c0_16 = arith.constant 0 : index
    %c0_17 = arith.constant 0 : index
    %31 = vector.load %arg6[%c0_16, %c0_17] : memref<768x256xf32, #tpu.memory_space<vmem>>, vector<768x256xf32>
    %cst_18 = arith.constant dense<0.000000e+00> : vector<14x256xf32>
    %32 = tpu.matmul %30, %31, %cst_18 {dimension_numbers = #tpu.dot_dimension_numbers<[1], [0], [0], [1], [0, 0, 1, 1], [], []>} : vector<14x768xf32>, vector<768x256xf32>, vector<14x256xf32> -> vector<14x256xf32>
    %c0_19 = arith.constant 0 : index
    %c0_20 = arith.constant 0 : index
    %33 = vector.load %arg7[%c0_19, %c0_20] : memref<1x256xf32, #tpu.memory_space<vmem>>, vector<1x256xf32>
    %34 = vector.broadcast %33 : vector<1x256xf32> to vector<14x256xf32>
    %35 = arith.addf %32, %34 : vector<14x256xf32>
    %36 = arith.negf %35 : vector<14x256xf32>
    %37 = math.exp %36 : vector<14x256xf32>
    %cst_21 = arith.constant 1.000000e+00 : f32
    %38 = vector.broadcast %cst_21 : f32 to vector<14x256xf32>
    %39 = arith.addf %38, %37 : vector<14x256xf32>
    %40 = arith.divf %38, %39 : vector<14x256xf32>
    %41 = arith.mulf %35, %40 : vector<14x256xf32>
    %42 = vector.shape_cast %41 : vector<14x256xf32> to vector<2x7x256xf32>
    %c0_22 = arith.constant 0 : index
    %c0_23 = arith.constant 0 : index
    %c0_24 = arith.constant 0 : index
    %43 = vector.load %arg8[%c0_22, %c0_23, %c0_24] : memref<2x7x256xf32, #tpu.memory_space<vmem>>, vector<2x7x256xf32>
    tpu.vector_store %arg8[%c0_22, %c0_23, %c0_24], %42 {strides = array<i32>} : memref<2x7x256xf32, #tpu.memory_space<vmem>>, vector<2x7x256xf32>,
    return
  }
  func.func @transform_0(%arg0: i32) -> (i32, i32) {
    %c0_i32 = arith.constant 0 : i32
    %c0_i32_0 = arith.constant 0 : i32
    return %arg0, %c0_i32 : i32, i32
  }
  func.func @transform_1(%arg0: i32) -> (i32, i32, i32) {
    %c0_i32 = arith.constant 0 : i32
    %c0_i32_0 = arith.constant 0 : i32
    %c0_i32_1 = arith.constant 0 : i32
    return %arg0, %c0_i32, %c0_i32_0 : i32, i32, i32
  }
  func.func @transform_2(%arg0: i32) -> (i32, i32, i32) {
    %c0_i32 = arith.constant 0 : i32
    %c0_i32_0 = arith.constant 0 : i32
    %c0_i32_1 = arith.constant 0 : i32
    return %arg0, %c0_i32, %c0_i32_0 : i32, i32, i32
  }
  func.func @transform_3(%arg0: i32) -> (i32, i32, i32) {
    %c0_i32 = arith.constant 0 : i32
    %c0_i32_0 = arith.constant 0 : i32
    %c0_i32_1 = arith.constant 0 : i32
    return %arg0, %c0_i32, %c0_i32_0 : i32, i32, i32
  }
  func.func @transform_4(%arg0: i32) -> (i32, i32, i32) {
    %c0_i32 = arith.constant 0 : i32
    %c0_i32_0 = arith.constant 0 : i32
    %c0_i32_1 = arith.constant 0 : i32
    return %arg0, %c0_i32, %c0_i32_0 : i32, i32, i32
  }
  func.func @transform_5(%arg0: i32) -> (i32, i32) {
    %c0_i32 = arith.constant 0 : i32
    %c0_i32_0 = arith.constant 0 : i32
    %c0_i32_1 = arith.constant 0 : i32
    return %c0_i32, %c0_i32_0 : i32, i32
  }
  func.func @transform_6(%arg0: i32) -> (i32, i32) {
    %c0_i32 = arith.constant 0 : i32
    %c0_i32_0 = arith.constant 0 : i32
    %c0_i32_1 = arith.constant 0 : i32
    return %c0_i32, %c0_i32_0 : i32, i32
  }
  func.func @transform_7(%arg0: i32) -> (i32, i32, i32) {
    %c0_i32 = arith.constant 0 : i32
    %c0_i32_0 = arith.constant 0 : i32
    %c0_i32_1 = arith.constant 0 : i32
    return %arg0, %c0_i32, %c0_i32_0 : i32, i32, i32
  }
}

</mosaic_0001>

<bundles_post_ra>
// kernel: tpu_custom_call.1
= control target key start
LH: loop header
LB: loop body
LE: loop exit
PB: predicated region body
PF: predicated region fallthrough
CT: control target
= control target key end

     0   :  { %12 = vsyncpa [#allocation3], 0  ;;  %s2866_s0 = inlined_call_operand.hbm [shape: s32[2,16], index: 0, kind: input, shape index: {}]   ;;  %s2867_s1 = inlined_call_operand.hbm [shape: bf16[2,16,768], index: 1, kind: input, shape index: {}]   ;;  %s2868_s2 = inlined_call_operand.hbm [shape: bf16[2,16,768], index: 2, kind: input, shape index: {}]   ;;  %s2869_s3 = inlined_call_operand.hbm [shape: bf16[2,16,768], index: 3, kind: input, shape index: {}]   ;;  %s2870_s4 = inlined_call_operand.hbm [shape: bf16[2,16,768], index: 4, kind: input, shape index: {}]   ;;  %s2871_s5 = inlined_call_operand.hbm [shape: f32[768,256], index: 5, kind: input, shape index: {}]   ;;  %s2872_s6 = inlined_call_operand.vmem [shape: f32[1,256], index: 6, kind: input, shape index: {}]   ;;  %s2873_s7 = inlined_call_operand.vmem [shape: f32[2,7,256], index: 7, kind: output, shape index: {}]  }
   0x1   :  { %13 = vsyncpa [#allocation5], 0 }
   0x2   :  { %14 = vsyncpa [#allocation8], 0 }
   0x3   :  { %15 = vsyncpa [#allocation11], 0  ;;  %s2467_s24 = smov [#allocation4]   ;;  %s2327_s28 = scalar_lea.hbm %s2867_s1, 1536 }
   0x4   :  { %s31_s25 = sshll.u32 %s2467_s24, 4  ;;  %p2328_p0 = scmp.ne.s32.totalorder %s2867_s1, %s2327_s28  ;;  %s32_s25 = int_to_ptr.vmem [resolvable:$true] %s31_s25 }
   0x5   :  { %p2331_p1 = scmp.lt.u32.totalorder %s2327_s28, %s2867_s1 }
   0x7   :  { %p2333_p2 = pnand %p2331_p1, %p2328_p0 }
   0x9   :  { %2336 = shalt.err (!%p2333_p2)
}
   0xa   :  { %s2337_s10 = scalar_lea.vmem %s32_s25, 1536  ;;  %p2342_p4 = scmp.lt.s32.totalorder %s32_s25, %s32_s25 }
   0xb   :  { %p2338_p3 = scmp.ne.s32.totalorder %s32_s25, %s2337_s10  ;;  %p2343_p5 = scmp.lt.s32.totalorder %s2337_s10, %s2337_s10 }
   0xd   :  { %p2344_p6 = por %p2343_p5, %p2342_p4 }
   0xf   :  { %p2345_p7 = pnand %p2344_p6, %p2338_p3 }
  0x11   :  { %2348 = shalt.err (!%p2345_p7)
}
  0x12   :  { %s2468_s11 = smov 384   ;;  %s2469_s12 = smov 24  }
  0x13   :  { %37 = dma.hbm_to_vmem [thread:$0]  %s2867_s1, 1536, %s32_s25, [#allocation5], %s2468_s11, %s2468_s11, %s2469_s12  }
  0x14   :  { %s2470_s15 = smov [#allocation7]   ;;  %s2471_s17 = smov [#allocation2]  }
  0x15   :  { %s55_s16 = sshll.u32 %s2470_s15, 4  ;;  %s22_s18 = sshll.u32 %s2471_s17, 4  ;;  %s56_s16 = int_to_ptr.vmem [resolvable:$true] %s55_s16  ;;  %s23_s18 = int_to_ptr.vmem [resolvable:$true] %s22_s18 }
  0x16   :  { %s2349_s21 = scalar_lea.hbm %s2869_s3, 1536 }
  0x17   :  { %p2350_p8 = scmp.ne.s32.totalorder %s2869_s3, %s2349_s21  ;;  %p2353_p9 = scmp.lt.u32.totalorder %s2349_s21, %s2869_s3 }
  0x19   :  { %p2355_p10 = pnand %p2353_p9, %p2350_p8 }
  0x1b   :  { %2358 = shalt.err (!%p2355_p10)
}
  0x1c   :  { %s2359_s1 = scalar_lea.vmem %s56_s16, 1536  ;;  %p2364_p12 = scmp.lt.s32.totalorder %s56_s16, %s56_s16 }
  0x1d   :  { %p2360_p11 = scmp.ne.s32.totalorder %s56_s16, %s2359_s1  ;;  %p2365_p13 = scmp.lt.s32.totalorder %s2359_s1, %s2359_s1 }
  0x1f   :  { %p2366_p0 = por %p2365_p13, %p2364_p12 }
  0x21   :  { %p2367_p1 = pnand %p2366_p0, %p2360_p11 }
  0x23   :  { %2370 = shalt.err (!%p2367_p1)
}
  0x24   :  { %61 = dma.hbm_to_vmem [thread:$0]  %s2869_s3, 1536, %s56_s16, [#allocation8], %s2468_s11, %s2468_s11, %s2469_s12  }
  0x25   :  { %s2371_s30 = scalar_lea.hbm %s2866_s0, 32 }
  0x26   :  { %p2372_p2 = scmp.ne.s32.totalorder %s2866_s0, %s2371_s30  ;;  %p2375_p3 = scmp.lt.u32.totalorder %s2371_s30, %s2866_s0 }
  0x28   :  { %p2377_p4 = pnand %p2375_p3, %p2372_p2 }
  0x2a   :  { %2380 = shalt.err (!%p2377_p4)
}
  0x2b   :  { %s2381_s14 = scalar_lea.vmem %s23_s18, 32  ;;  %p2386_p6 = scmp.lt.s32.totalorder %s23_s18, %s23_s18 }
  0x2c   :  { %p2382_p5 = scmp.ne.s32.totalorder %s23_s18, %s2381_s14  ;;  %p2387_p7 = scmp.lt.s32.totalorder %s2381_s14, %s2381_s14 }
  0x2e   :  { %p2388_p8 = por %p2387_p7, %p2386_p6 }
  0x30   :  { %p2389_p9 = pnand %p2388_p8, %p2382_p5 }
  0x32   :  { %2392 = shalt.err (!%p2389_p9)
}
  0x33   :  { %25 = dma.hbm_to_vmem [thread:$0]  %s2866_s0, 32, %s23_s18, [#allocation3]  }
  0x34   :  { %s2472_s16 = smov [#allocation6]   ;;  %s2473_s19 = smov [#allocation9]  }
  0x35   :  { %s43_s17 = sshll.u32 %s2472_s16, 4  ;;  %s67_s20 = sshll.u32 %s2473_s19, 4  ;;  %s44_s17 = int_to_ptr.vmem [resolvable:$true] %s43_s17  ;;  %s68_s20 = int_to_ptr.vmem [resolvable:$true] %s67_s20 }
  0x36   :  { %s2393_s23 = scalar_lea.hbm %s2868_s2, 1536 }
  0x37   :  { %p2394_p10 = scmp.ne.s32.totalorder %s2868_s2, %s2393_s23  ;;  %p2397_p11 = scmp.lt.u32.totalorder %s2393_s23, %s2868_s2 }
  0x39   :  { %p2399_p12 = pnand %p2397_p11, %p2394_p10 }
  0x3b   :  { %2402 = shalt.err (!%p2399_p12)
}
  0x3c   :  { %s2403_s0 = scalar_lea.vmem %s44_s17, 1536  ;;  %p2408_p0 = scmp.lt.s32.totalorder %s44_s17, %s44_s17 }
  0x3d   :  { %p2404_p13 = scmp.ne.s32.totalorder %s44_s17, %s2403_s0  ;;  %p2409_p1 = scmp.lt.s32.totalorder %s2403_s0, %s2403_s0 }
  0x3f   :  { %p2410_p2 = por %p2409_p1, %p2408_p0 }
  0x41   :  { %p2411_p3 = pnand %p2410_p2, %p2404_p13 }
  0x43   :  { %2414 = shalt.err (!%p2411_p3)
}
  0x44   :  { %49 = dma.hbm_to_vmem [thread:$0]  %s2868_s2, 1536, %s44_s17, [#allocation5], %s2468_s11, %s2468_s11, %s2469_s12  }
  0x45   :  { %s2415_s30 = scalar_lea.hbm %s2870_s4, 1536 }
  0x46   :  { %p2416_p4 = scmp.ne.s32.totalorder %s2870_s4, %s2415_s30  ;;  %p2419_p5 = scmp.lt.u32.totalorder %s2415_s30, %s2870_s4 }
  0x48   :  { %p2421_p6 = pnand %p2419_p5, %p2416_p4 }
  0x4a   :  { %2424 = shalt.err (!%p2421_p6)
}
  0x4b   :  { %s2425_s14 = scalar_lea.vmem %s68_s20, 1536  ;;  %p2430_p8 = scmp.lt.s32.totalorder %s68_s20, %s68_s20 }
  0x4c   :  { %p2426_p7 = scmp.ne.s32.totalorder %s68_s20, %s2425_s14  ;;  %p2431_p9 = scmp.lt.s32.totalorder %s2425_s14, %s2425_s14 }
  0x4e   :  { %p2432_p10 = por %p2431_p9, %p2430_p8 }
  0x50   :  { %p2433_p11 = pnand %p2432_p10, %p2426_p7 }
  0x52   :  { %2436 = shalt.err (!%p2433_p11)
}
  0x53   :  { %73 = dma.hbm_to_vmem [thread:$0]  %s2870_s4, 1536, %s68_s20, [#allocation8], %s2468_s11, %s2468_s11, %s2469_s12  }
  0x54   :  { %s2474_s15 = smov [#allocation10]   ;;  %s2437_s21 = scalar_lea.hbm %s2871_s5, 24576 }
  0x55   :  { %s79_s16 = sshll.u32 %s2474_s15, 4  ;;  %p2438_p12 = scmp.ne.s32.totalorder %s2871_s5, %s2437_s21  ;;  %s80_s16 = int_to_ptr.vmem [resolvable:$true] %s79_s16 }
  0x56   :  { %p2441_p13 = scmp.lt.u32.totalorder %s2437_s21, %s2871_s5 }
  0x58   :  { %p2443_p0 = pnand %p2441_p13, %p2438_p12 }
  0x5a   :  { %2446 = shalt.err (!%p2443_p0)
}
  0x5b   :  { %s2447_s1 = scalar_lea.vmem %s80_s16, 24576  ;;  %p2452_p2 = scmp.lt.s32.totalorder %s80_s16, %s80_s16 }
  0x5c   :  { %p2448_p1 = scmp.ne.s32.totalorder %s80_s16, %s2447_s1  ;;  %p2453_p3 = scmp.lt.s32.totalorder %s2447_s1, %s2447_s1 }
  0x5e   :  { %p2454_p4 = por %p2453_p3, %p2452_p2 }
  0x60   :  { %p2455_p5 = pnand %p2454_p4, %p2448_p1 }
  0x62   :  { %2458 = shalt.err (!%p2455_p5)
}
  0x63   :  { %s2475_s4 = smov 256   ;;  %s2476_s11 = smov 16  }
  0x64   :  { %85 = dma.hbm_to_vmem [thread:$0]  %s2871_s5, 24576, %s80_s16, [#allocation11], %s2475_s4, %s2475_s4, %s2476_s11  }
  0x65   :  { %2459 = dma.done.wait [#allocation3], 32  }
  0x66   :  { %2460 = vsyncadd [#allocation3], 4294967264 }
  0x67   :  { %2461 = dma.done.wait [#allocation5], 3072  }
  0x68   :  { %2462 = vsyncadd [#allocation5], 4294964224 }
  0x69   :  { %2463 = dma.done.wait [#allocation8], 3072  }
  0x6a   :  { %2464 = vsyncadd [#allocation8], 4294964224 }
  0x6b   :  { %2465 = dma.done.wait [#allocation11], 24576  }
  0x6c   :  { %2466 = vsyncadd [#allocation11], 4294942720  ;;  %v323_v0 = vlaneseq  ;;  %v2477_v1 = vmov 0.0   ;;  %v2478_v2 = vmov 1966171168   ;;  %v106_v6 = vld [vmem:[#allocation4] sm:$0xff] }
  0x6d   :  { %430 = vmatprep.mubr.f32.mxu1 %v2477_v1  ;;  %v335_v3 = vunpack.c.l.s4 %v2478_v2  ;;  %v109_v7 = vld [vmem:[#allocation4 + $0x18] sm:$0xff]  ;;  %v142_v8 = vld [vmem:[#allocation6] sm:$0xff]  ;;  %v119_v11 = vunpack.c.h.bf16 %v106_v6  ;;  %v118_v17 = vunpack.c.l.bf16 %v106_v6  ;;  %v107_v33 = vld [vmem:[#allocation4 + $0x8] sm:$0xff]  ;;  %vm362_vm0 = vcmask 130048  }
  0x6e   :  { %v2604_v4 = vshrl.u32 %v323_v0, 7  ;;  %v125_v12 = vunpack.c.h.bf16 %v109_v7  ;;  %v145_v13 = vld [vmem:[#allocation6 + $0x18] sm:$0xff]  ;;  %v155_v14 = vunpack.c.h.bf16 %v142_v8  ;;  %v202_v15 = vld [vmem:[#allocation7] sm:$0xff]  ;;  %v124_v23 = vunpack.c.l.bf16 %v109_v7  ;;  %v143_v43 = vld [vmem:[#allocation6 + $0x8] sm:$0xff] }
  0x6f   :  { %v336_v5 = vunpack.c.0.s8 %v335_v3  ;;  %v205_v16 = vld [vmem:[#allocation7 + $0x18] sm:$0xff]  ;;  %v161_v18 = vunpack.c.h.bf16 %v145_v13  ;;  %v215_v19 = vunpack.c.h.bf16 %v202_v15  ;;  %v262_v21 = vld [vmem:[#allocation9] sm:$0xff]  ;;  %v154_v27 = vunpack.c.l.bf16 %v142_v8  ;;  %v203_v53 = vld [vmem:[#allocation7 + $0x8] sm:$0xff] }
  0x70   :  { %v2610_v10 = vsub.s32 0, %v2604_v4  ;;  %v221_v20 = vunpack.c.h.bf16 %v205_v16  ;;  %v265_v22 = vld [vmem:[#allocation9 + $0x18] sm:$0xff]  ;;  %v179_v24 = vadd.f32 %v155_v14, %v119_v11  ;;  %v275_v25 = vunpack.c.h.bf16 %v262_v21  ;;  %v110_v38 = vld [vmem:[#allocation4 + $0x20] sm:$0xff]  ;;  %v263_v62 = vld [vmem:[#allocation9 + $0x8] sm:$0xff] }
  0x71   :  { %v2607_v9 = vsub.s32 %v336_v5, %v2604_v4  ;;  %v281_v26 = vunpack.c.h.bf16 %v265_v22  ;;  %v2612_v28 = vld.sshfl [vmem:[#allocation2] sm:$0x11 pattern:$0x75316420]  ;;  %v185_v29 = vadd.f32 %v161_v18, %v125_v12  ;;  %v160_v30 = vunpack.c.l.bf16 %v145_v13  ;;  %v146_v48 = vld [vmem:[#allocation6 + $0x20] sm:$0xff]  ;;  %v108_v12 = vld [vmem:[#allocation4 + $0x10] sm:$0xff] }
  0x72   :  { %v214_v31 = vunpack.c.l.bf16 %v202_v15  ;;  %v220_v32 = vunpack.c.l.bf16 %v205_v16  ;;  %v239_v34 = vadd.f32 %v215_v19, %v179_v24  ;;  %v178_v35 = vadd.f32 %v154_v27, %v118_v17  ;;  %v206_v58 = vld [vmem:[#allocation7 + $0x20] sm:$0xff]  ;;  %v111_v17 = vld [vmem:[#allocation4 + $0x28] sm:$0xff] }
  0x73   :  { %v274_v36 = vunpack.c.l.bf16 %v262_v21  ;;  %v2615_v37 = vadd.s32 1, %v2604_v4  ;;  %v245_v39 = vadd.f32 %v221_v20, %v185_v29  ;;  %v184_v40 = vadd.f32 %v160_v30, %v124_v23  ;;  %v266_v63 = vld [vmem:[#allocation9 + $0x20] sm:$0xff]  ;;  %v147_v27 = vld [vmem:[#allocation6 + $0x28] sm:$0xff] }
  0x74   :  { %v280_v41 = vunpack.c.l.bf16 %v265_v22  ;;  %v340_v42 = vrot.slane %v2612_v28, %v2607_v9  ;;  %v299_v44 = vadd.f32 %v275_v25, %v239_v34  ;;  %v238_v45 = vadd.f32 %v214_v31, %v178_v35  ;;  %v144_v22 = vld [vmem:[#allocation6 + $0x10] sm:$0xff] }
  0x75   :  { %v120_v46 = vunpack.c.l.bf16 %v107_v33  ;;  %v121_v47 = vunpack.c.h.bf16 %v107_v33  ;;  %v305_v49 = vadd.f32 %v281_v26, %v245_v39  ;;  %v244_v50 = vadd.f32 %v220_v32, %v184_v40  ;;  %v204_v33 = vld [vmem:[#allocation7 + $0x10] sm:$0xff]  ;;  %v207_v39 = vld [vmem:[#allocation7 + $0x28] sm:$0xff] }
  0x76   :  { %v351_v51 = vrot.slane %v340_v42, %v2610_v10  ;;  %v126_v52 = vunpack.c.l.bf16 %v110_v38  ;;  %v298_v54 = vadd.f32 %v274_v36, %v238_v45  ;;  %v127_v55 = vunpack.c.h.bf16 %v110_v38  ;;  %v267_v45 = vld [vmem:[#allocation9 + $0x28] sm:$0xff] }
  0x77   :  { %v156_v56 = vunpack.c.l.bf16 %v143_v43  ;;  %v157_v57 = vunpack.c.h.bf16 %v143_v43  ;;  %v2067_v59 = vpack.c.bf16 %v305_v49, %v299_v44  ;;  %v304_v60 = vadd.f32 %v280_v41, %v244_v50  ;;  %v264_v44 = vld [vmem:[#allocation9 + $0x10] sm:$0xff] }
  0x78   :  { %vm356_vm1 = vcmp.eq.s32.totalorder %v351_v51, %v2615_v37  ;;  %v162_v61 = vunpack.c.l.bf16 %v146_v48  ;;  %v163_v2 = vunpack.c.h.bf16 %v146_v48  ;;  %v216_v5 = vunpack.c.l.bf16 %v203_v53 }
  0x79   :  { %v2622_v0 = vsel %vm356_vm1, 1.0, %v2477_v1  ;;  %v181_v3 = vadd.f32 %v157_v57, %v121_v47  ;;  %2068 = vmatprep.subr.bf16.mxu1 %v2067_v59  ;;  %v2069_v6 = vpack.c.bf16 %v304_v60, %v298_v54  ;;  %v217_v7 = vunpack.c.h.bf16 %v203_v53  ;;  %v112_v54 = vld [vmem:[#allocation4 + $0x30] sm:$0xff] }
  0x7a   :  { %v222_v8 = vunpack.c.l.bf16 %v206_v58  ;;  %v223_v11 = vunpack.c.h.bf16 %v206_v58  ;;  %v187_v13 = vadd.f32 %v163_v2, %v127_v55  ;;  %v276_v14 = vunpack.c.l.bf16 %v263_v62  ;;  %v115_v55 = vld [vmem:[#allocation4 + $0x48] sm:$0xff]  ;;  %v148_v2 = vld [vmem:[#allocation6 + $0x30] sm:$0xff] }
  0x7b   :  { %v277_v15 = vunpack.c.h.bf16 %v263_v62  ;;  %v282_v16 = vunpack.c.l.bf16 %v266_v63  ;;  %2070 = vmatpush1.bf16.msra.mxu1 %v2069_v6  ;;  %v241_v18 = vadd.f32 %v217_v7, %v181_v3  ;;  %v283_v19 = vunpack.c.h.bf16 %v266_v63  ;;  %v151_v3 = vld [vmem:[#allocation6 + $0x48] sm:$0xff] }
  0x7c   :  { %v180_v20 = vadd.f32 %v156_v56, %v120_v46  ;;  %v186_v21 = vadd.f32 %v162_v61, %v126_v52  ;;  %v333_v23 = vcombine.high %v2612_v28, %v2612_v28  ;;  %v247_v24 = vadd.f32 %v223_v11, %v187_v13  ;;  %v208_v11 = vld [vmem:[#allocation7 + $0x30] sm:$0xff] }
  0x7d   :  { %v122_v25 = vunpack.c.l.bf16 %v108_v12  ;;  %v123_v26 = vunpack.c.h.bf16 %v108_v12  ;;  %v301_v29 = vadd.f32 %v277_v15, %v241_v18  ;;  %v129_v32 = vunpack.c.h.bf16 %v111_v17 }
  0x7e   :  { %v240_v30 = vadd.f32 %v216_v5, %v180_v20  ;;  %v246_v31 = vadd.f32 %v222_v8, %v186_v21  ;;  %2042 = vmatmul.mubr.msk.f32.vlgmr.msra.gmra.mrb[0].mxu1 %vm362_vm0, %v2622_v0  ;;  %v307_v34 = vadd.f32 %v283_v19, %v247_v24  ;;  %v128_v35 = vunpack.c.l.bf16 %v111_v17  ;;  %v268_v21 = vld [vmem:[#allocation9 + $0x30] sm:$0xff] }
  0x7f   :  { %v158_v36 = vunpack.c.l.bf16 %v144_v22  ;;  %v159_v38 = vunpack.c.h.bf16 %v144_v22  ;;  %501 = vmatprep.mubr.f32.mxu1 %v2477_v1  ;;  %v164_v42 = vunpack.c.l.bf16 %v147_v27  ;;  %v165_v43 = vunpack.c.h.bf16 %v147_v27  ;;  %v271_v27 = vld [vmem:[#allocation9 + $0x48] sm:$0xff] }
  0x80   :  { %v300_v40 = vadd.f32 %v276_v14, %v240_v30  ;;  %v306_v41 = vadd.f32 %v282_v16, %v246_v31  ;;  %v2071_v46 = vpack.c.bf16 %v307_v34, %v301_v29  ;;  %v218_v48 = vunpack.c.l.bf16 %v204_v33  ;;  %v211_v16 = vld [vmem:[#allocation7 + $0x48] sm:$0xff] }
  0x81   :  { %v183_v47 = vadd.f32 %v159_v38, %v123_v26  ;;  %v219_v49 = vunpack.c.h.bf16 %v204_v33  ;;  %v189_v51 = vadd.f32 %v165_v43, %v129_v32  ;;  %v224_v52 = vunpack.c.l.bf16 %v207_v39  ;;  %v113_v33 = vld [vmem:[#allocation4 + $0x38] sm:$0xff]  ;;  %v116_v43 = vld [vmem:[#allocation4 + $0x50] sm:$0xff] }
  0x82   :  { %v2073_v50 = vpack.c.bf16 %v306_v41, %v300_v40  ;;  %v225_v53 = vunpack.c.h.bf16 %v207_v39  ;;  %2072 = vmatprep.subr.bf16.mxu1 %v2071_v46  ;;  %v278_v57 = vunpack.c.l.bf16 %v264_v44  ;;  %v279_v58 = vunpack.c.h.bf16 %v264_v44 }
  0x83   :  { %v243_v56 = vadd.f32 %v219_v49, %v183_v47  ;;  %v285_v59 = vunpack.c.h.bf16 %v267_v45  ;;  %v284_v61 = vunpack.c.l.bf16 %v267_v45  ;;  %v182_v62 = vadd.f32 %v158_v36, %v122_v25 }
  0x84   :  { %2074 = vmatpush1.bf16.msra.mxu1 %v2073_v50  ;;  %v249_v60 = vadd.f32 %v225_v53, %v189_v51  ;;  %v188_v63 = vadd.f32 %v164_v42, %v128_v35  ;;  %v130_v6 = vunpack.c.l.bf16 %v112_v54  ;;  %v131_v7 = vunpack.c.h.bf16 %v112_v54  ;;  %v152_v53 = vld [vmem:[#allocation6 + $0x50] sm:$0xff] }
  0x85   :  { %v303_v5 = vadd.f32 %v279_v58, %v243_v56  ;;  %v137_v8 = vunpack.c.h.bf16 %v115_v55  ;;  %v242_v13 = vadd.f32 %v218_v48, %v182_v62  ;;  %v136_v15 = vunpack.c.l.bf16 %v115_v55  ;;  %v149_v48 = vld [vmem:[#allocation6 + $0x38] sm:$0xff] }
  0x86   :  { %v309_v12 = vadd.f32 %v285_v59, %v249_v60  ;;  %v248_v14 = vadd.f32 %v224_v52, %v188_v63  ;;  %v166_v17 = vunpack.c.l.bf16 %v148_v2  ;;  %v167_v18 = vunpack.c.h.bf16 %v148_v2  ;;  %v209_v58 = vld [vmem:[#allocation7 + $0x38] sm:$0xff] }
  0x87   :  { %2043 = vmatmul.mubr.msk.f32.vlgmr.msra.gmra.mrb[2].mxu1 %vm362_vm0, %v2622_v0  ;;  %v172_v19 = vunpack.c.l.bf16 %v151_v3  ;;  %v173_v20 = vunpack.c.h.bf16 %v151_v3  ;;  %v302_v24 = vadd.f32 %v278_v57, %v242_v13  ;;  %v227_v26 = vunpack.c.h.bf16 %v208_v11  ;;  %v269_v3 = vld [vmem:[#allocation9 + $0x38] sm:$0xff] }
  0x88   :  { %v2075_v22 = vpack.c.bf16 %v309_v12, %v303_v5  ;;  %v308_v25 = vadd.f32 %v284_v61, %v248_v14  ;;  %572 = vmatprep.mubr.f32.mxu1 %v2477_v1  ;;  %v191_v29 = vadd.f32 %v167_v18, %v131_v7  ;;  %v226_v31 = vunpack.c.l.bf16 %v208_v11  ;;  %v212_v61 = vld [vmem:[#allocation7 + $0x50] sm:$0xff] }
  0x89   :  { %v197_v30 = vadd.f32 %v173_v20, %v137_v8  ;;  %v233_v32 = vunpack.c.h.bf16 %v211_v16  ;;  %v232_v35 = vunpack.c.l.bf16 %v211_v16  ;;  %v286_v36 = vunpack.c.l.bf16 %v268_v21  ;;  %v272_v5 = vld [vmem:[#allocation9 + $0x50] sm:$0xff]  ;;  %v114_v16 = vld [vmem:[#allocation4 + $0x40] sm:$0xff] }
  0x8a   :  { %2076 = vmatprep.subr.bf16.mxu1 %v2075_v22  ;;  %v2077_v34 = vpack.c.bf16 %v308_v25, %v302_v24  ;;  %v287_v38 = vunpack.c.h.bf16 %v268_v21  ;;  %v251_v39 = vadd.f32 %v227_v26, %v191_v29  ;;  %v293_v41 = vunpack.c.h.bf16 %v271_v27  ;;  %v150_v26 = vld [vmem:[#allocation6 + $0x40] sm:$0xff] }
  0x8b   :  { %v257_v40 = vadd.f32 %v233_v32, %v197_v30  ;;  %v190_v42 = vadd.f32 %v166_v17, %v130_v6  ;;  %v292_v44 = vunpack.c.l.bf16 %v271_v27  ;;  %v196_v45 = vadd.f32 %v172_v19, %v136_v15  ;;  %v117_v17 = vld [vmem:[#allocation4 + $0x58] sm:$0xff] }
  0x8c   :  { %2078 = vmatpush1.bf16.msra.mxu1 %v2077_v34  ;;  %v347_v46 = vrot.slane %v333_v23, %v2607_v9  ;;  %v132_v47 = vunpack.c.l.bf16 %v113_v33  ;;  %v311_v49 = vadd.f32 %v287_v38, %v251_v39  ;;  %v133_v52 = vunpack.c.h.bf16 %v113_v33  ;;  %v153_v27 = vld [vmem:[#allocation6 + $0x58] sm:$0xff]  ;;  %v210_v33 = vld [vmem:[#allocation7 + $0x40] sm:$0xff] }
  0x8d   :  { %v317_v50 = vadd.f32 %v293_v41, %v257_v40  ;;  %v250_v51 = vadd.f32 %v226_v31, %v190_v42  ;;  %v256_v54 = vadd.f32 %v232_v35, %v196_v45  ;;  %v138_v56 = vunpack.c.l.bf16 %v116_v43  ;;  %v213_v39 = vld [vmem:[#allocation7 + $0x58] sm:$0xff] }
  0x8e   :  { %v355_v55 = vrot.slane %v347_v46, %v2610_v10  ;;  %v139_v57 = vunpack.c.h.bf16 %v116_v43  ;;  %v168_v28 = vunpack.c.l.bf16 %v149_v48  ;;  %v169_v23 = vunpack.c.h.bf16 %v149_v48 }
  0x8f   :  { %2044 = vmatmul.mubr.msk.f32.vlgmr.msra.gmra.mrb[4].mxu1 %vm362_vm0, %v2622_v0  ;;  %v2079_v59 = vpack.c.bf16 %v317_v50, %v311_v49  ;;  %v310_v60 = vadd.f32 %v286_v36, %v250_v51  ;;  %v316_v62 = vadd.f32 %v292_v44, %v256_v54  ;;  %v174_v63 = vunpack.c.l.bf16 %v152_v53  ;;  %v270_v44 = vld [vmem:[#allocation9 + $0x40] sm:$0xff]  ;;  %v273_v49 = vld [vmem:[#allocation9 + $0x58] sm:$0xff]  ;;  %v1131_v54 = vld [vmem:[#allocation10 + $0x208] sm:$0xff] }
  0x90   :  { %646 = vmatprep.mubr.f32.mxu1 %v2477_v1  ;;  %vm357_vm2 = vcmp.eq.s32.totalorder %v355_v55, %v2615_v37  ;;  %v175_v2 = vunpack.c.h.bf16 %v152_v53  ;;  %v193_v7 = vadd.f32 %v169_v23, %v133_v52  ;;  %v228_v8 = vunpack.c.l.bf16 %v209_v58  ;;  %v1133_v55 = vld [vmem:[#allocation10 + $0x218] sm:$0xff] }
  0x91   :  { %2080 = vmatprep.subr.bf16.mxu1 %v2079_v59  ;;  %v2642_v6 = vsel %vm357_vm2, 1.0, %v2477_v1  ;;  %v229_v11 = vunpack.c.h.bf16 %v209_v58  ;;  %vm795_vm3 = vcmask 129024   ;;  %v2081_v12 = vpack.c.bf16 %v316_v62, %v310_v60  ;;  %v1130_v60 = vld [vmem:[#allocation10 + $0x200] sm:$0xff] }
  0x92   :  { %v199_v13 = vadd.f32 %v175_v2, %v139_v57  ;;  %v234_v14 = vunpack.c.l.bf16 %v212_v61  ;;  %v235_v15 = vunpack.c.h.bf16 %v212_v61  ;;  %v288_v37 = vunpack.c.l.bf16 %v269_v3  ;;  %v1135_v2 = vld [vmem:[#allocation10 + $0x228] sm:$0xff] }
  0x93   :  { %v253_v18 = vadd.f32 %v229_v11, %v193_v7  ;;  %v289_v19 = vunpack.c.h.bf16 %v269_v3  ;;  %v295_v20 = vunpack.c.h.bf16 %v272_v5  ;;  %2082 = vmatpush1.bf16.msra.mxu1 %v2081_v12  ;;  %v294_v22 = vunpack.c.l.bf16 %v272_v5  ;;  %v1137_v3 = vld [vmem:[#allocation10 + $0x238] sm:$0xff] }
  0x94   :  { %v259_v21 = vadd.f32 %v235_v15, %v199_v13  ;;  %v192_v24 = vadd.f32 %v168_v28, %v132_v47  ;;  %v198_v25 = vadd.f32 %v174_v63, %v138_v56  ;;  %v134_v30 = vunpack.c.l.bf16 %v114_v16  ;;  %v1132_v63 = vld [vmem:[#allocation10 + $0x210] sm:$0xff]  ;;  %v1067_v15 = vld [vmem:[#allocation10 + $0x8] sm:$0xff] }
  0x95   :  { %v313_v29 = vadd.f32 %v289_v19, %v253_v18  ;;  %v135_v31 = vunpack.c.h.bf16 %v114_v16  ;;  %v141_v32 = vunpack.c.h.bf16 %v117_v17  ;;  %v140_v38 = vunpack.c.l.bf16 %v117_v17  ;;  %v1134_v16 = vld [vmem:[#allocation10 + $0x220] sm:$0xff]  ;;  %v1136_v17 = vld [vmem:[#allocation10 + $0x230] sm:$0xff]  ;;  %v1069_v19 = vld [vmem:[#allocation10 + $0x18] sm:$0xff] }
  0x96   :  { %v319_v34 = vadd.f32 %v295_v20, %v259_v21  ;;  %v252_v35 = vadd.f32 %v228_v8, %v192_v24  ;;  %v258_v36 = vadd.f32 %v234_v14, %v198_v25  ;;  %2045 = vmatmul.mubr.msk.f32.vlgmr.msra.gmra.mrb[6].mxu1 %vm362_vm0, %v2642_v6  ;;  %v170_v40 = vunpack.c.l.bf16 %v150_v26  ;;  %v1141_v24 = vld [vmem:[#allocation10 + $0x258] sm:$0xff] }
  0x97   :  { %v171_v41 = vunpack.c.h.bf16 %v150_v26  ;;  %v176_v42 = vunpack.c.l.bf16 %v153_v27  ;;  %v177_v43 = vunpack.c.h.bf16 %v153_v27  ;;  %717 = vmatprep.mubr.f32.mxu1 %v2477_v1  ;;  %v231_v48 = vunpack.c.h.bf16 %v210_v33  ;;  %v1066_v27 = vld [vmem:[#allocation10] sm:$0xff] }
  0x98   :  { %v2083_v45 = vpack.c.bf16 %v319_v34, %v313_v29  ;;  %v312_v46 = vadd.f32 %v288_v37, %v252_v35  ;;  %v318_v47 = vadd.f32 %v294_v22, %v258_v36  ;;  %v230_v52 = vunpack.c.l.bf16 %v210_v33  ;;  %v1139_v22 = vld [vmem:[#allocation10 + $0x248] sm:$0xff]  ;;  %v1068_v29 = vld [vmem:[#allocation10 + $0x10] sm:$0xff]  ;;  %v1138_v34 = vld [vmem:[#allocation10 + $0x240] sm:$0xff] }
  0x99   :  { %v195_v50 = vadd.f32 %v171_v41, %v135_v31  ;;  %v201_v51 = vadd.f32 %v177_v43, %v141_v32  ;;  %v237_v53 = vunpack.c.h.bf16 %v213_v39  ;;  %v236_v57 = vunpack.c.l.bf16 %v213_v39  ;;  %v1071_v32 = vld [vmem:[#allocation10 + $0x28] sm:$0xff]  ;;  %v1140_v35 = vld [vmem:[#allocation10 + $0x250] sm:$0xff]  ;;  %v1070_v43 = vld [vmem:[#allocation10 + $0x20] sm:$0xff] }
  0x9a   :  { %2084 = vmatprep.subr.bf16.mxu1 %v2083_v45  ;;  %v2085_v56 = vpack.c.bf16 %v318_v47, %v312_v46  ;;  %v290_v58 = vunpack.c.l.bf16 %v270_v44  ;;  %v291_v59 = vunpack.c.h.bf16 %v270_v44  ;;  %v297_v61 = vunpack.c.h.bf16 %v273_v49  ;;  %v1143_v39 = vld [vmem:[#allocation10 + $0x268] sm:$0xff]  ;;  %v1072_v44 = vld [vmem:[#allocation10 + $0x30] sm:$0xff]  ;;  %v1077_v47 = vld [vmem:[#allocation10 + $0x58] sm:$0xff] }
  0x9b   :  { %v255_v28 = vadd.f32 %v231_v48, %v195_v50  ;;  %v261_v23 = vadd.f32 %v237_v53, %v201_v51  ;;  %v194_v62 = vadd.f32 %v170_v40, %v134_v30  ;;  %v296_v5 = vunpack.c.l.bf16 %v273_v49  ;;  %v1145_v40 = vld [vmem:[#allocation10 + $0x278] sm:$0xff]  ;;  %v1075_v46 = vld [vmem:[#allocation10 + $0x48] sm:$0xff]  ;;  %v1074_v50 = vld [vmem:[#allocation10 + $0x40] sm:$0xff] }
  0x9c   :  { %2086 = vmatpush1.bf16.msra.mxu1 %v2085_v56  ;;  %v200_v7 = vadd.f32 %v176_v42, %v140_v38  ;;  %v796_v8 = vsel %vm795_vm3, %v2622_v0, 0.0  ;;  %v2155_v11 = vpack.c.bf16 %v1133_v55, %v1131_v54  ;;  %v799_v37 = vsel %vm795_vm3, %v2642_v6, 0.0  ;;  %v1073_v38 = vld [vmem:[#allocation10 + $0x38] sm:$0xff]  ;;  %v1076_v51 = vld [vmem:[#allocation10 + $0x50] sm:$0xff]  ;;  %v1079_v53 = vld [vmem:[#allocation10 + $0x68] sm:$0xff] }
  0x9d   :  { %v315_v12 = vadd.f32 %v291_v59, %v255_v28  ;;  %v321_v13 = vadd.f32 %v297_v61, %v261_v23  ;;  %v254_v14 = vadd.f32 %v230_v52, %v194_v62  ;;  %797 = vadd.xlane.f32.xlu0 %v796_v8  ;;  %v2157_v20 = vpack.c.bf16 %v1132_v63, %v1130_v60  ;;  %v1081_v54 = vld [vmem:[#allocation10 + $0x78] sm:$0xff]  ;;  %v1142_v55 = vld [vmem:[#allocation10 + $0x260] sm:$0xff]  ;;  %v1080_v59 = vld [vmem:[#allocation10 + $0x70] sm:$0xff] }
  0x9e   :  { %v260_v18 = vadd.f32 %v236_v57, %v200_v7  ;;  %2156 = vmatprep.subr.bf16.mxu0 %v2155_v11  ;;  %v2159_v21 = vpack.c.bf16 %v1137_v3, %v1135_v2  ;;  %v2161_v30 = vpack.c.bf16 %v1136_v17, %v1134_v16  ;;  %v2091_v31 = vpack.c.bf16 %v1069_v19, %v1067_v15  ;;  %v1144_v57 = vld [vmem:[#allocation10 + $0x270] sm:$0xff]  ;;  %v1147_v28 = vld [vmem:[#allocation10 + $0x288] sm:$0xff]  ;;  %v1149_v23 = vld [vmem:[#allocation10 + $0x298] sm:$0xff] }
  0x9f   :  { %2046 = vmatmul.mubr.msk.f32.vlgmr.msra.gmra.mrb[8].mxu1 %vm362_vm0, %v2642_v6  ;;  %v2087_v0 = vpack.c.bf16 %v321_v13, %v315_v12  ;;  %v314_v25 = vadd.f32 %v290_v58, %v254_v14  ;;  %2158 = vmatpush1.bf16.msra.mxu0 %v2157_v20  ;;  %v2163_v33 = vpack.c.bf16 %v1141_v24, %v1139_v22  ;;  %v1078_v58 = vld [vmem:[#allocation10 + $0x60] sm:$0xff]  ;;  %v1083_v61 = vld [vmem:[#allocation10 + $0x88] sm:$0xff]  ;;  %v1085_v63 = vld [vmem:[#allocation10 + $0x98] sm:$0xff] }
  0xa0   :  { %v320_v26 = vadd.f32 %v296_v5, %v260_v18  ;;  %788 = vmatprep.mubr.f32.mxu1 %v2477_v1  ;;  %2160 = vmatprep.subr.bf16.mxu0 %v2159_v21  ;;  %v2093_v41 = vpack.c.bf16 %v1068_v29, %v1066_v27  ;;  %v2165_v1 = vpack.c.bf16 %v1140_v35, %v1138_v34  ;;  %v1146_v2 = vld [vmem:[#allocation10 + $0x280] sm:$0xff]  ;;  %v1148_v3 = vld [vmem:[#allocation10 + $0x290] sm:$0xff]  ;;  %v1151_v12 = vld [vmem:[#allocation10 + $0x2a8] sm:$0xff] }
  0xa1   :  { %2088 = vmatprep.subr.bf16.mxu1 %v2087_v0  ;;  %800 = vadd.xlane.f32.xlu0 %v799_v37  ;;  %v2095_v42 = vpack.c.bf16 %v1073_v38, %v1071_v32  ;;  %v2167_v45 = vpack.c.bf16 %v1145_v40, %v1143_v39  ;;  %v2097_v48 = vpack.c.bf16 %v1072_v44, %v1070_v43  ;;  %v1082_v8 = vld [vmem:[#allocation10 + $0x80] sm:$0xff]  ;;  %v1084_v11 = vld [vmem:[#allocation10 + $0x90] sm:$0xff]  ;;  %v1153_v14 = vld [vmem:[#allocation10 + $0x2b8] sm:$0xff] }
  0xa2   :  { %v2089_v36 = vpack.c.bf16 %v320_v26, %v314_v25  ;;  %v2099_v49 = vpack.c.bf16 %v1077_v47, %v1075_v46  ;;  %v2101_v52 = vpack.c.bf16 %v1076_v51, %v1074_v50  ;;  %v2103_v56 = vpack.c.bf16 %v1081_v54, %v1079_v53  ;;  %v1087_v15 = vld [vmem:[#allocation10 + $0xa8] sm:$0xff]  ;;  %v1089_v16 = vld [vmem:[#allocation10 + $0xb8] sm:$0xff]  ;;  %v1150_v37 = vld [vmem:[#allocation10 + $0x2a0] sm:$0xff] }
  0xa3   :  { %2162 = vmatpush1.bf16.msra.mxu0 %v2161_v30  ;;  %v2105_v60 = vpack.c.bf16 %v1080_v59, %v1078_v58  ;;  %v2171_v62 = vpack.c.bf16 %v1149_v23, %v1147_v28  ;;  %v2107_v5 = vpack.c.bf16 %v1085_v63, %v1083_v61  ;;  %v2173_v7 = vpack.c.bf16 %v1148_v3, %v1146_v2  ;;  %v1152_v19 = vld [vmem:[#allocation10 + $0x2b0] sm:$0xff]  ;;  %v1086_v20 = vld [vmem:[#allocation10 + $0xa0] sm:$0xff]  ;;  %v1155_v22 = vld [vmem:[#allocation10 + $0x2c8] sm:$0xff] }
  0xa4   :  { %2090 = vmatpush1.bf16.msra.mxu1 %v2089_v36  ;;  %2164 = vmatprep.subr.bf16.mxu0 %v2163_v33  ;;  %v2109_v13 = vpack.c.bf16 %v1084_v11, %v1082_v8  ;;  %v2175_v17 = vpack.c.bf16 %v1153_v14, %v1151_v12  ;;  %v2111_v18 = vpack.c.bf16 %v1089_v16, %v1087_v15  ;;  %v1088_v21 = vld [vmem:[#allocation10 + $0xb0] sm:$0xff]  ;;  %v1157_v24 = vld [vmem:[#allocation10 + $0x2d8] sm:$0xff]  ;;  %v1091_v26 = vld [vmem:[#allocation10 + $0xc8] sm:$0xff] }
  0xa5   :  { %2092 = vmatprep.subr.bf16.mxu1 %v2091_v31  ;;  %v2177_v0 = vpack.c.bf16 %v1152_v19, %v1150_v37  ;;  %v2113_v25 = vpack.c.bf16 %v1088_v21, %v1086_v20  ;;  %v1093_v27 = vld [vmem:[#allocation10 + $0xd8] sm:$0xff]  ;;  %v2179_v29 = vpack.c.bf16 %v1157_v24, %v1155_v22  ;;  %v1154_v31 = vld [vmem:[#allocation10 + $0x2c0] sm:$0xff]  ;;  %v1156_v32 = vld [vmem:[#allocation10 + $0x2d0] sm:$0xff] }
  0xa6   :  { %v2115_v30 = vpack.c.bf16 %v1093_v27, %v1091_v26  ;;  %v2181_v33 = vpack.c.bf16 %v1156_v32, %v1154_v31  ;;  %v1090_v34 = vld [vmem:[#allocation10 + $0xc0] sm:$0xff]  ;;  %v1092_v35 = vld [vmem:[#allocation10 + $0xd0] sm:$0xff]  ;;  %v1159_v38 = vld [vmem:[#allocation10 + $0x2e8] sm:$0xff] }
  0xa7   :  { %2047 = vmatmul.mubr.msk.f32.vlgmr.msra.gmra.mrb[10].mxu1 %vm362_vm0, %v2642_v6  ;;  %2166 = vmatpush1.bf16.msra.mxu0 %v2165_v1  ;;  %v2169_v6 = vpack.c.bf16 %v1144_v57, %v1142_v55  ;;  %v2117_v36 = vpack.c.bf16 %v1092_v35, %v1090_v34  ;;  %v1161_v39 = vld [vmem:[#allocation10 + $0x2f8] sm:$0xff]  ;;  %v1095_v40 = vld [vmem:[#allocation10 + $0xe8] sm:$0xff]  ;;  %v1160_v43 = vld [vmem:[#allocation10 + $0x2f0] sm:$0xff] }
  0xa8   :  { %2094 = vmatpush1.bf16.msra.mxu1 %v2093_v41  ;;  %2168 = vmatprep.subr.bf16.mxu0 %v2167_v45  ;;  %v2183_v41 = vpack.c.bf16 %v1161_v39, %v1159_v38  ;;  %v1097_v1 = vld [vmem:[#allocation10 + $0xf8] sm:$0xff]  ;;  %v1094_v46 = vld [vmem:[#allocation10 + $0xe0] sm:$0xff]  ;;  %v1096_v47 = vld [vmem:[#allocation10 + $0xf0] sm:$0xff] }
  0xa9   :  { %2096 = vmatprep.subr.bf16.mxu1 %v2095_v42  ;;  %v1158_v42 = vld [vmem:[#allocation10 + $0x2e0] sm:$0xff]  ;;  %v2119_v44 = vpack.c.bf16 %v1097_v1, %v1095_v40  ;;  %v1165_v50 = vld [vmem:[#allocation10 + $0x318] sm:$0xff]  ;;  %v1099_v51 = vld [vmem:[#allocation10 + $0x108] sm:$0xff] }
  0xaa   :  { %v2185_v45 = vpack.c.bf16 %v1160_v43, %v1158_v42  ;;  %v1101_v53 = vld [vmem:[#allocation10 + $0x118] sm:$0xff]  ;;  %v1162_v54 = vld [vmem:[#allocation10 + $0x300] sm:$0xff]  ;;  %v1164_v55 = vld [vmem:[#allocation10 + $0x310] sm:$0xff] }
  0xab   :  { %2170 = vmatpush1.bf16.msra.mxu0 %v2169_v6  ;;  %v2189_v57 = vpack.c.bf16 %v1164_v55, %v1162_v54  ;;  %v1098_v58 = vld [vmem:[#allocation10 + $0x100] sm:$0xff]  ;;  %v1100_v59 = vld [vmem:[#allocation10 + $0x110] sm:$0xff]  ;;  %v1169_v28 = vld [vmem:[#allocation10 + $0x338] sm:$0xff] }
  0xac   :  { %2098 = vmatpush1.bf16.msra.mxu1 %v2097_v48  ;;  %2172 = vmatprep.subr.bf16.mxu0 %v2171_v62  ;;  %v2121_v48 = vpack.c.bf16 %v1096_v47, %v1094_v46  ;;  %v2125_v6 = vpack.c.bf16 %v1100_v59, %v1098_v58  ;;  %v1103_v61 = vld [vmem:[#allocation10 + $0x128] sm:$0xff]  ;;  %v1105_v62 = vld [vmem:[#allocation10 + $0x138] sm:$0xff]  ;;  %v1166_v63 = vld [vmem:[#allocation10 + $0x320] sm:$0xff] }
  0xad   :  { %2100 = vmatprep.subr.bf16.mxu1 %v2099_v49  ;;  %v1163_v49 = vld [vmem:[#allocation10 + $0x308] sm:$0xff]  ;;  %v2127_v2 = vpack.c.bf16 %v1105_v62, %v1103_v61  ;;  %v1168_v3 = vld [vmem:[#allocation10 + $0x330] sm:$0xff]  ;;  %v1109_v16 = vld [vmem:[#allocation10 + $0x158] sm:$0xff] }
  0xae   :  { %v2193_v8 = vpack.c.bf16 %v1168_v3, %v1166_v63  ;;  %v1171_v12 = vld [vmem:[#allocation10 + $0x348] sm:$0xff]  ;;  %v1106_v20 = vld [vmem:[#allocation10 + $0x140] sm:$0xff]  ;;  %v1108_v21 = vld [vmem:[#allocation10 + $0x150] sm:$0xff] }
  0xaf   :  { %2174 = vmatpush1.bf16.msra.mxu0 %v2173_v7  ;;  %v1104_v7 = vld [vmem:[#allocation10 + $0x130] sm:$0xff]  ;;  %v1107_v14 = vld [vmem:[#allocation10 + $0x148] sm:$0xff]  ;;  %v2133_v22 = vpack.c.bf16 %v1108_v21, %v1106_v20  ;;  %v1113_v27 = vld [vmem:[#allocation10 + $0x178] sm:$0xff] }
  0xb0   :  { %2102 = vmatpush1.bf16.msra.mxu1 %v2101_v52  ;;  %2176 = vmatprep.subr.bf16.mxu0 %v2175_v17  ;;  %v2187_v52 = vpack.c.bf16 %v1165_v50, %v1163_v49  ;;  %v1170_v17 = vld [vmem:[#allocation10 + $0x340] sm:$0xff]  ;;  %v2131_v37 = vpack.c.bf16 %v1109_v16, %v1107_v14  ;;  %v1175_v24 = vld [vmem:[#allocation10 + $0x368] sm:$0xff]  ;;  %v1176_v31 = vld [vmem:[#allocation10 + $0x370] sm:$0xff] }
  0xb1   :  { %2104 = vmatprep.subr.bf16.mxu1 %v2103_v56  ;;  %v2123_v56 = vpack.c.bf16 %v1101_v53, %v1099_v51  ;;  %v1111_v26 = vld [vmem:[#allocation10 + $0x168] sm:$0xff]  ;;  %v1110_v32 = vld [vmem:[#allocation10 + $0x160] sm:$0xff]  ;;  %v1181_v38 = vld [vmem:[#allocation10 + $0x398] sm:$0xff] }
  0xb2   :  { %v1115_v40 = vld [vmem:[#allocation10 + $0x188] sm:$0xff]  ;;  %v1178_v1 = vld [vmem:[#allocation10 + $0x380] sm:$0xff]  ;;  %v1180_v43 = vld [vmem:[#allocation10 + $0x390] sm:$0xff] }
  0xb3   :  { %2178 = vmatpush1.bf16.msra.mxu0 %v2177_v0  ;;  %v1177_v0 = vld [vmem:[#allocation10 + $0x378] sm:$0xff]  ;;  %v2205_v46 = vpack.c.bf16 %v1180_v43, %v1178_v1  ;;  %v1119_v51 = vld [vmem:[#allocation10 + $0x1a8] sm:$0xff]  ;;  %v1182_v53 = vld [vmem:[#allocation10 + $0x3a0] sm:$0xff] }
  0xb4   :  { %2106 = vmatpush1.bf16.msra.mxu1 %v2105_v60  ;;  %2180 = vmatprep.subr.bf16.mxu0 %v2179_v29  ;;  %v1167_v60 = vld [vmem:[#allocation10 + $0x328] sm:$0xff]  ;;  %v1174_v29 = vld [vmem:[#allocation10 + $0x360] sm:$0xff]  ;;  %v1185_v49 = vld [vmem:[#allocation10 + $0x3b8] sm:$0xff] }
  0xb5   :  { %2108 = vmatprep.subr.bf16.mxu1 %v2107_v5  ;;  %v2191_v23 = vpack.c.bf16 %v1169_v28, %v1167_v60  ;;  %v1102_v5 = vld [vmem:[#allocation10 + $0x120] sm:$0xff]  ;;  %v2201_v34 = vpack.c.bf16 %v1176_v31, %v1174_v29  ;;  %v1184_v55 = vld [vmem:[#allocation10 + $0x3b0] sm:$0xff]  ;;  %v1189_v60 = vld [vmem:[#allocation10 + $0x3d8] sm:$0xff] }
  0xb6   :  { %v2129_v11 = vpack.c.bf16 %v1104_v7, %v1102_v5  ;;  %v2209_v58 = vpack.c.bf16 %v1184_v55, %v1182_v53  ;;  %v1125_v61 = vld [vmem:[#allocation10 + $0x1d8] sm:$0xff]  ;;  %v1186_v62 = vld [vmem:[#allocation10 + $0x3c0] sm:$0xff]  ;;  %v1124_v5 = vld [vmem:[#allocation10 + $0x1d0] sm:$0xff] }
  0xb7   :  { %2182 = vmatpush1.bf16.msra.mxu0 %v2181_v33  ;;  %v1112_v33 = vld [vmem:[#allocation10 + $0x170] sm:$0xff]  ;;  %v1122_v3 = vld [vmem:[#allocation10 + $0x1c0] sm:$0xff]  ;;  %v1127_v14 = vld [vmem:[#allocation10 + $0x1e8] sm:$0xff] }
  0xb8   :  { %2110 = vmatpush1.bf16.msra.mxu1 %v2109_v13  ;;  %2184 = vmatprep.subr.bf16.mxu0 %v2183_v41  ;;  %v1173_v13 = vld [vmem:[#allocation10 + $0x358] sm:$0xff]  ;;  %v2137_v35 = vpack.c.bf16 %v1112_v33, %v1110_v32  ;;  %v1190_v16 = vld [vmem:[#allocation10 + $0x3e0] sm:$0xff] }
  0xb9   :  { %2112 = vmatprep.subr.bf16.mxu1 %v2111_v18  ;;  %v2195_v15 = vpack.c.bf16 %v1173_v13, %v1171_v12  ;;  %v1172_v18 = vld [vmem:[#allocation10 + $0x350] sm:$0xff]  ;;  %v1117_v41 = vld [vmem:[#allocation10 + $0x198] sm:$0xff] }
  0xba   :  { %v2197_v19 = vpack.c.bf16 %v1172_v18, %v1170_v17  ;;  %v2139_v42 = vpack.c.bf16 %v1117_v41, %v1115_v40  ;;  %v1193_v12 = vld [vmem:[#allocation10 + $0x3f8] sm:$0xff]  ;;  %v1192_v18 = vld [vmem:[#allocation10 + $0x3f0] sm:$0xff] }
  0xbb   :  { %2186 = vmatpush1.bf16.msra.mxu0 %v2185_v45  ;;  %v1116_v45 = vld [vmem:[#allocation10 + $0x190] sm:$0xff]  ;;  %v2217_v20 = vpack.c.bf16 %v1192_v18, %v1190_v16 }
  0xbc   :  { %2114 = vmatpush1.bf16.msra.mxu1 %v2113_v25  ;;  %2188 = vmatprep.subr.bf16.mxu0 %v2187_v52  ;;  %v2199_v25 = vpack.c.bf16 %v1177_v0, %v1175_v24  ;;  %v1121_v52 = vld [vmem:[#allocation10 + $0x1b8] sm:$0xff] }
  0xbd   :  { %2116 = vmatprep.subr.bf16.mxu1 %v2115_v30  ;;  %v2135_v30 = vpack.c.bf16 %v1113_v27, %v1111_v26  ;;  %v2143_v54 = vpack.c.bf16 %v1121_v52, %v1119_v51  ;;  %v1197_v24 = vld [vmem:[#allocation10 + $0x418] sm:$0xff] }
  0xbf   :  { %2190 = vmatpush1.bf16.msra.mxu0 %v2189_v57  ;;  %v1120_v57 = vld [vmem:[#allocation10 + $0x1b0] sm:$0xff] }
  0xc0   :  { %2118 = vmatpush1.bf16.msra.mxu1 %v2117_v36  ;;  %2192 = vmatprep.subr.bf16.mxu0 %v2191_v23  ;;  %v1179_v36 = vld [vmem:[#allocation10 + $0x388] sm:$0xff] }
  0xc1   :  { %2120 = vmatprep.subr.bf16.mxu1 %v2119_v44  ;;  %v2203_v39 = vpack.c.bf16 %v1181_v38, %v1179_v36  ;;  %v1114_v44 = vld [vmem:[#allocation10 + $0x180] sm:$0xff]  ;;  %v1123_v23 = vld [vmem:[#allocation10 + $0x1c8] sm:$0xff] }
  0xc2   :  { %v2141_v47 = vpack.c.bf16 %v1116_v45, %v1114_v44  ;;  %v2147_v63 = vpack.c.bf16 %v1125_v61, %v1123_v23 }
  0xc3   :  { %2194 = vmatpush1.bf16.msra.mxu0 %v2193_v8  ;;  %v2149_v8 = vpack.c.bf16 %v1124_v5, %v1122_v3 }
  0xc4   :  { %2122 = vmatpush1.bf16.msra.mxu1 %v2121_v48  ;;  %2196 = vmatprep.subr.bf16.mxu0 %v2195_v15  ;;  %v1183_v48 = vld [vmem:[#allocation10 + $0x3a8] sm:$0xff]  ;;  %v1129_v15 = vld [vmem:[#allocation10 + $0x1f8] sm:$0xff] }
  0xc5   :  { %2124 = vmatprep.subr.bf16.mxu1 %v2123_v56  ;;  %v2207_v50 = vpack.c.bf16 %v1185_v49, %v1183_v48  ;;  %v1118_v56 = vld [vmem:[#allocation10 + $0x1a0] sm:$0xff]  ;;  %v2151_v17 = vpack.c.bf16 %v1129_v15, %v1127_v14 }
  0xc6   :  { %v2145_v59 = vpack.c.bf16 %v1120_v57, %v1118_v56 }
  0xc7   :  { %2198 = vmatpush1.bf16.msra.mxu0 %v2197_v19  ;;  %v1128_v19 = vld [vmem:[#allocation10 + $0x1f0] sm:$0xff] }
  0xc8   :  { %2126 = vmatpush1.bf16.msra.mxu1 %v2125_v6  ;;  %2200 = vmatprep.subr.bf16.mxu0 %v2199_v25  ;;  %v1187_v6 = vld [vmem:[#allocation10 + $0x3c8] sm:$0xff] }
  0xc9   :  { %2128 = vmatprep.subr.bf16.mxu1 %v2127_v2  ;;  %v2211_v28 = vpack.c.bf16 %v1189_v60, %v1187_v6  ;;  %v1188_v2 = vld [vmem:[#allocation10 + $0x3d0] sm:$0xff] }
  0xca   :  { %v2213_v7 = vpack.c.bf16 %v1188_v2, %v1186_v62 }
  0xcb   :  { %2202 = vmatpush1.bf16.msra.mxu0 %v2201_v34 }
  0xcc   :  { %2130 = vmatpush1.bf16.msra.mxu1 %v2129_v11  ;;  %2204 = vmatprep.subr.bf16.mxu0 %v2203_v39  ;;  %v1191_v11 = vld [vmem:[#allocation10 + $0x3e8] sm:$0xff] }
  0xcd   :  { %2132 = vmatprep.subr.bf16.mxu1 %v2131_v37  ;;  %v2215_v13 = vpack.c.bf16 %v1193_v12, %v1191_v11  ;;  %v1126_v37 = vld [vmem:[#allocation10 + $0x1e0] sm:$0xff] }
  0xce   :  { %v2153_v21 = vpack.c.bf16 %v1128_v19, %v1126_v37 }
  0xcf   :  { %2206 = vmatpush1.bf16.msra.mxu0 %v2205_v46 }
  0xd0   :  { %2134 = vmatpush1.bf16.msra.mxu1 %v2133_v22  ;;  %2208 = vmatprep.subr.bf16.mxu0 %v2207_v50  ;;  %v1195_v22 = vld [vmem:[#allocation10 + $0x408] sm:$0xff] }
  0xd1   :  { %2136 = vmatprep.subr.bf16.mxu1 %v2135_v30  ;;  %v2219_v0 = vpack.c.bf16 %v1197_v24, %v1195_v22 }
  0xd3   :  { %2210 = vmatpush1.bf16.msra.mxu0 %v2209_v58 }
  0xd4   :  { %2138 = vmatpush1.bf16.msra.mxu1 %v2137_v35  ;;  %2212 = vmatprep.subr.bf16.mxu0 %v2211_v28 }
  0xd5   :  { %2140 = vmatprep.subr.bf16.mxu1 %v2139_v42 }
  0xd7   :  { %2214 = vmatpush1.bf16.msra.mxu0 %v2213_v7 }
  0xd8   :  { %2142 = vmatpush1.bf16.msra.mxu1 %v2141_v47  ;;  %2216 = vmatprep.subr.bf16.mxu0 %v2215_v13 }
  0xd9   :  { %2144 = vmatprep.subr.bf16.mxu1 %v2143_v54 }
  0xdb   :  { %2218 = vmatpush1.bf16.msra.mxu0 %v2217_v20 }
  0xdc   :  { %2146 = vmatpush1.bf16.msra.mxu1 %v2145_v59  ;;  %2220 = vmatprep.subr.bf16.mxu0 %v2219_v0 }
  0xdd   :  { %2148 = vmatprep.subr.bf16.mxu1 %v2147_v63 }
  0xe0   :  { %2150 = vmatpush1.bf16.msra.mxu1 %v2149_v8 }
  0xe1   :  { %2152 = vmatprep.subr.bf16.mxu1 %v2151_v17 }
  0xe4   :  { %2154 = vmatpush1.bf16.msra.mxu1 %v2153_v21 }
 0x12a   :  { %v798_v25 = vpop.xlane.xlu0 %797 }
 0x12b   :  { %v802_v26 = vmax.f32 %v798_v25, 1.0 }
 0x12d   :  { %2307 = vrcp.f32 %v802_v26 }
 0x12e   :  { %v801_v33 = vpop.xlane.xlu0 %800 }
 0x12f   :  { %v803_v38 = vmax.f32 %v801_v33, 1.0 }
 0x131   :  { %2309 = vrcp.f32 %v803_v38  ;;  %v2694_v38 = vld [vmem:[#allocation10 + $0x400] sm:$0xff] }
 0x137   :  { %v2308_v27 = vpop.eup %2307 }
 0x138   :  { %v806_v29 = vmul.f32 0.25, %v2308_v27 }
 0x13b   :  { %v2310_v59 = vpop.eup %2309 }
 0x13c   :  { %v807_v63 = vmul.f32 0.25, %v2310_v59  ;;  %v2719_v59 = vld [vmem:[#allocation10 + $0x478] sm:$0xff] }
 0x151   :  { %v432_v30 = vpop.f32.mrb[0].mxu1 }
 0x152   :  { %v808_v31 = vmul.f32 %v806_v29, %v432_v30  ;;  %v434_v32 = vpop.f32.mrb[1].mxu1 }
 0x153   :  { %v809_v34 = vmul.f32 %v806_v29, %v434_v32 }
 0x155   :  { %v832_v35 = vcombine.low %v808_v31, %v809_v34  ;;  %v833_v36 = vcombine.high %v808_v31, %v809_v34 }
 0x157   :  { %v844_v44 = vrot.slane %v832_v35, %v2607_v9  ;;  %v851_v45 = vrot.slane %v833_v36, %v2607_v9 }
 0x15a   :  { %v503_v39 = vpop.f32.mrb[2].mxu1 }
 0x15b   :  { %v810_v40 = vmul.f32 %v806_v29, %v503_v39  ;;  %v505_v41 = vpop.f32.mrb[3].mxu1  ;;  %v2696_v39 = vld [vmem:[#allocation10 + $0x410] sm:$0xff] }
 0x15c   :  { %v811_v1 = vmul.f32 %v806_v29, %v505_v41 }
 0x15e   :  { %v834_v42 = vcombine.low %v810_v40, %v811_v1  ;;  %v835_v43 = vcombine.high %v810_v40, %v811_v1  ;;  %v2698_v40 = vld [vmem:[#allocation10 + $0x428] sm:$0xff] }
 0x160   :  { %v858_v46 = vrot.slane %v834_v42, %v2607_v9  ;;  %v865_v47 = vrot.slane %v835_v43, %v2607_v9 }
 0x162   :  { %v880_v48 = vcombine.low %v844_v44, %v858_v46  ;;  %v881_v49 = vcombine.high %v844_v44, %v858_v46  ;;  %v882_v50 = vcombine.low %v851_v45, %v865_v47  ;;  %v883_v51 = vcombine.high %v851_v45, %v865_v47  ;;  %v574_v52 = vpop.f32.mrb[4].mxu1  ;;  %v2700_v45 = vld [vmem:[#allocation10 + $0x438] sm:$0xff]  ;;  %v2702_v46 = vld [vmem:[#allocation10 + $0x420] sm:$0xff]  ;;  %v2704_v47 = vld [vmem:[#allocation10 + $0x430] sm:$0xff] }
 0x163   :  { %v812_v53 = vmul.f32 %v806_v29, %v574_v52  ;;  %v576_v54 = vpop.f32.mrb[5].mxu1  ;;  %v2710_v52 = vld [vmem:[#allocation10 + $0x440] sm:$0xff] }
 0x164   :  { %v892_v55 = vrot.slane %v880_v48, %v2607_v9  ;;  %v2662_v56 = vrot.slane %v882_v50, %v2607_v9  ;;  %v906_v57 = vrot.slane %v881_v49, %v2607_v9  ;;  %v2666_v58 = vrot.slane %v883_v51, %v2607_v9  ;;  %v2706_v50 = vld [vmem:[#allocation10 + $0x448] sm:$0xff]  ;;  %v2708_v51 = vld [vmem:[#allocation10 + $0x458] sm:$0xff] }
 0x165   :  { %v813_v6 = vmul.f32 %v806_v29, %v576_v54  ;;  %v2221_v54 = vpack.c.bf16 %v2696_v39, %v2694_v38 }
 0x166   :  { %v2048_v60 = vcombine.low %v892_v55, %v906_v57  ;;  %v2050_v28 = vcombine.high %v892_v55, %v906_v57  ;;  %v2052_v23 = vcombine.low %v2662_v56, %v2666_v58  ;;  %v2715_v55 = vld [vmem:[#allocation10 + $0x450] sm:$0xff]  ;;  %v2717_v57 = vld [vmem:[#allocation10 + $0x468] sm:$0xff] }
 0x167   :  { %v836_v61 = vcombine.low %v812_v53, %v813_v6  ;;  %v837_v62 = vcombine.high %v812_v53, %v813_v6 }
 0x168   :  { %v2671_v2 = vrot.slane %v2048_v60, %v2607_v9  ;;  %v2674_v3 = vrot.slane %v2050_v28, %v2607_v9 }
 0x169   :  { %v879_v5 = vrot.slane %v837_v62, %v2607_v9  ;;  %v648_v7 = vpop.f32.mrb[6].mxu1  ;;  %v872_v16 = vrot.slane %v836_v61, %v2607_v9 }
 0x16a   :  { %v1335_v8 = vcombine.high %v2671_v2, %v2674_v3  ;;  %v1334_v11 = vcombine.low %v2671_v2, %v2674_v3  ;;  %v650_v13 = vpop.f32.mrb[7].mxu1  ;;  %v814_v14 = vmul.f32 %v807_v63, %v648_v7  ;;  %v2223_v2 = vpack.c.bf16 %v2700_v45, %v2698_v40 }
 0x16b   :  { %v2682_v12 = vrot.slane %v879_v5, %v2607_v9  ;;  %v815_v15 = vmul.f32 %v807_v63, %v650_v13  ;;  %v884_v19 = vcombine.high %v872_v16, %v872_v16  ;;  %v885_v0 = vcombine.high %v879_v5, %v879_v5 }
 0x16c   :  { %v920_v29 = vrot.slane %v872_v16, %v2607_v9  ;;  %v2225_v3 = vpack.c.bf16 %v2704_v47, %v2702_v46  ;;  %v2227_v5 = vpack.c.bf16 %v2708_v51, %v2706_v50 }
 0x16d   :  { %v945_v17 = vcombine.high %v2662_v56, %v2682_v12  ;;  %v949_v18 = vcombine.low %v814_v14, %v815_v15  ;;  %v950_v37 = vcombine.high %v814_v14, %v815_v15  ;;  %v934_v25 = vrot.slane %v884_v19, %v2607_v9 }
 0x16e   :  { %v941_v34 = vrot.slane %v885_v0, %v2607_v9  ;;  %v2231_v14 = vpack.c.bf16 %v2719_v59, %v2717_v57  ;;  %v1312_v15 = vrot.slane %v2052_v23, %v2607_v9  ;;  %v1220_v57 = vld [vmem:[#allocation10 + $0x4d0] sm:$0xff]  ;;  %v1223_v59 = vld [vmem:[#allocation10 + $0x4e8] sm:$0xff] }
 0x16f   :  { %v961_v30 = vrot.slane %v949_v18, %v2607_v9  ;;  %v968_v31 = vrot.slane %v950_v37, %v2607_v9  ;;  %v2049_v35 = vcombine.low %v920_v29, %v934_v25  ;;  %v2051_v36 = vcombine.high %v920_v29, %v934_v25 }
 0x170   :  { %v2053_v6 = vcombine.low %v2682_v12, %v941_v34  ;;  %v1348_v18 = vrot.slane %v1334_v11, %v2607_v9 }
 0x171   :  { %v2723_v28 = vrot.slane %v2049_v35, %v2607_v9  ;;  %v2726_v61 = vrot.slane %v2051_v36, %v2607_v9 }
 0x172   :  { %v719_v20 = vpop.f32.mrb[8].mxu1 }
 0x173   :  { %v816_v21 = vmul.f32 %v807_v63, %v719_v20  ;;  %v721_v22 = vpop.f32.mrb[9].mxu1  ;;  %v2748_v20 = vrot.slane %v2053_v6, %v2607_v9  ;;  %v1337_v23 = vcombine.high %v2723_v28, %v2726_v61 }
 0x174   :  { %v817_v24 = vmul.f32 %v807_v63, %v721_v22 }
 0x176   :  { %v951_v26 = vcombine.low %v816_v21, %v817_v24  ;;  %v952_v27 = vcombine.high %v816_v21, %v817_v24  ;;  %v1336_v21 = vcombine.low %v2723_v28, %v2726_v61 }
 0x178   :  { %v975_v32 = vrot.slane %v951_v26, %v2607_v9  ;;  %v982_v33 = vrot.slane %v952_v27, %v2607_v9 }
 0x17a   :  { %v997_v41 = vcombine.low %v961_v30, %v975_v32  ;;  %v998_v1 = vcombine.high %v961_v30, %v975_v32  ;;  %v999_v42 = vcombine.low %v968_v31, %v982_v33  ;;  %v1000_v43 = vcombine.high %v968_v31, %v982_v33  ;;  %v790_v44 = vpop.f32.mrb[10].mxu1 }
 0x17b   :  { %v818_v48 = vmul.f32 %v807_v63, %v790_v44  ;;  %v792_v49 = vpop.f32.mrb[11].mxu1 }
 0x17c   :  { %v1009_v53 = vrot.slane %v997_v41, %v2607_v9  ;;  %v819_v60 = vmul.f32 %v807_v63, %v792_v49  ;;  %v2229_v63 = vpack.c.bf16 %v2715_v55, %v2710_v52  ;;  %v1016_v22 = vrot.slane %v999_v42, %v2607_v9 }
 0x17d   :  { %v1023_v25 = vrot.slane %v998_v1, %v2607_v9  ;;  %v1030_v26 = vrot.slane %v1000_v43, %v2607_v9 }
 0x17e   :  { %v2054_v62 = vcombine.low %v945_v17, %v1009_v53  ;;  %v953_v7 = vcombine.low %v818_v48, %v819_v60  ;;  %v954_v13 = vcombine.high %v818_v48, %v819_v60  ;;  %v1362_v17 = vrot.slane %v1335_v8, %v2607_v9 }
 0x180   :  { %v1326_v16 = vrot.slane %v2054_v62, %v2607_v9  ;;  %v989_v37 = vrot.slane %v953_v7, %v2607_v9  ;;  %v996_v19 = vrot.slane %v954_v13, %v2607_v9  ;;  %v1369_v62 = vrot.slane %v1337_v23, %v2607_v9 }
 0x182   :  { %v1339_v56 = vcombine.high %v1312_v15, %v1326_v16  ;;  %v1338_v58 = vcombine.low %v1312_v15, %v1326_v16  ;;  %v1001_v8 = vcombine.high %v989_v37, %v989_v37  ;;  %v1002_v24 = vcombine.high %v996_v19, %v996_v19 }
 0x183   :  { %v1037_v11 = vrot.slane %v989_v37, %v2607_v9  ;;  %v1044_v0 = vrot.slane %v996_v19, %v2607_v9  ;;  %v2776_v37 = vrot.slane %v1336_v21, %v2607_v9 }
 0x184   :  { %v1390_v27 = vrot.slane %v1339_v56, %v2607_v9  ;;  %v1376_v29 = vrot.slane %v1338_v58, %v2607_v9  ;;  %v1051_v30 = vrot.slane %v1001_v8, %v2607_v9  ;;  %v1058_v31 = vrot.slane %v1002_v24, %v2607_v9 }
 0x185   :  { %v1059_v32 = vcombine.low %v1009_v53, %v1037_v11  ;;  %v1060_v33 = vcombine.high %v1009_v53, %v1037_v11  ;;  %v1061_v34 = vcombine.low %v1016_v22, %v1044_v0  ;;  %v1062_v35 = vcombine.high %v1016_v22, %v1044_v0 }
 0x186   :  { %v1401_v36 = vcombine.low %v1362_v17, %v1390_v27  ;;  %v1402_v40 = vcombine.high %v1362_v17, %v1390_v27  ;;  %v1063_v41 = vcombine.low %v1023_v25, %v1051_v30  ;;  %v1064_v42 = vcombine.high %v1023_v25, %v1051_v30 }
 0x187   :  { %v1065_v44 = vcombine.low %v1030_v26, %v1058_v31  ;;  %v1398_v1 = vcombine.low %v1348_v18, %v1376_v29  ;;  %v1399_v43 = vcombine.high %v1348_v18, %v1376_v29  ;;  %v2056_v45 = vcombine.low %v1023_v25, %v1060_v33  ;;  %v1208_v31 = vld [vmem:[#allocation10 + $0x470] sm:$0xff]  ;;  %v1213_v33 = vld [vmem:[#allocation10 + $0x498] sm:$0xff] }
 0x188   :  { %1596 = vmatprep.mubr.f32.mxu1 %v1401_v36  ;;  %1673 = vmatprep.mubr.f32.mxu0 %v1402_v40  ;;  %v2060_v48 = vcombine.low %v1030_v26, %v1062_v35  ;;  %v2057_v49 = vcombine.high %v1063_v41, %v1037_v11  ;;  %v2058_v60 = vcombine.low %v1064_v42, %v1016_v22  ;;  %v1210_v36 = vld [vmem:[#allocation10 + $0x480] sm:$0xff]  ;;  %v1212_v40 = vld [vmem:[#allocation10 + $0x490] sm:$0xff]  ;;  %v1215_v41 = vld [vmem:[#allocation10 + $0x4a8] sm:$0xff] }
 0x189   :  { %v2061_v6 = vcombine.high %v1065_v44, %v1044_v0  ;;  %1597 = vmatmul.mubr.f32.vlgmr.msra.gmra.mrb[12].mxu1 %v1398_v1  ;;  %v2055_v28 = vcombine.high %v2682_v12, %v1059_v32  ;;  %1674 = vmatmul.mubr.f32.vlgmr.msra.gmra.mrb[0].mxu0 %v1399_v43  ;;  %v1416_v53 = vrot.slane %v2056_v45, %v2607_v9  ;;  %v1211_v32 = vld [vmem:[#allocation10 + $0x488] sm:$0xff]  ;;  %v1217_v42 = vld [vmem:[#allocation10 + $0x4b8] sm:$0xff]  ;;  %v1214_v43 = vld [vmem:[#allocation10 + $0x4a0] sm:$0xff] }
 0x18a   :  { %v1444_v61 = vrot.slane %v2060_v48, %v2607_v9  ;;  %v2059_v7 = vcombine.high %v1051_v30, %v1061_v34  ;;  %2222 = vmatpush1.bf16.msra.mxu0 %v2221_v54  ;;  %v1430_v13 = vrot.slane %v2058_v60, %v2607_v9  ;;  %v1423_v16 = vrot.slane %v2057_v49, %v2607_v9  ;;  %v1206_v30 = vld [vmem:[#allocation10 + $0x460] sm:$0xff]  ;;  %v1216_v45 = vld [vmem:[#allocation10 + $0x4b0] sm:$0xff]  ;;  %v1219_v48 = vld [vmem:[#allocation10 + $0x4c8] sm:$0xff] }
 0x18b   :  { %v1333_v15 = vrot.slane %v2055_v28, %v2607_v9  ;;  %v1451_v12 = vrot.slane %v2061_v6, %v2607_v9  ;;  %2224 = vmatprep.subr.bf16.mxu0 %v2223_v2  ;;  %v2233_v34 = vpack.c.bf16 %v1208_v31, %v1206_v30  ;;  %v2235_v35 = vpack.c.bf16 %v1213_v33, %v1211_v32  ;;  %v1221_v49 = vld [vmem:[#allocation10 + $0x4d8] sm:$0xff]  ;;  %v1222_v28 = vld [vmem:[#allocation10 + $0x4e0] sm:$0xff]  ;;  %v1244_v31 = vld [vmem:[#allocation10 + $0x590] sm:$0xff] }
 0x18c   :  { %v1456_v17 = vcombine.high %v1444_v61, %v1444_v61  ;;  %v1492_v18 = vrot.slane %v1444_v61, %v2607_v9  ;;  %v1437_v19 = vrot.slane %v2059_v7, %v2607_v9  ;;  %v1453_v22 = vcombine.high %v1416_v53, %v1430_v13  ;;  %v1227_v61 = vld [vmem:[#allocation10 + $0x508] sm:$0xff]  ;;  %v1242_v30 = vld [vmem:[#allocation10 + $0x580] sm:$0xff]  ;;  %v1249_v33 = vld [vmem:[#allocation10 + $0x5b8] sm:$0xff] }
 0x18d   :  { %v1452_v38 = vcombine.low %v1416_v53, %v1430_v13  ;;  %v1340_v39 = vcombine.low %v2748_v20, %v1333_v15  ;;  %v1341_v54 = vcombine.high %v2748_v20, %v1333_v15  ;;  %v1457_v23 = vcombine.high %v1451_v12, %v1451_v12  ;;  %v1224_v53 = vld [vmem:[#allocation10 + $0x4f0] sm:$0xff]  ;;  %v1226_v15 = vld [vmem:[#allocation10 + $0x500] sm:$0xff]  ;;  %v1247_v32 = vld [vmem:[#allocation10 + $0x5a8] sm:$0xff] }
 0x18e   :  { %v1506_v56 = vrot.slane %v1456_v17, %v2607_v9  ;;  %v1455_v58 = vcombine.high %v1423_v16, %v1437_v19  ;;  %v1454_v8 = vcombine.low %v1423_v16, %v1437_v19  ;;  %2226 = vmatpush1.bf16.msra.mxu0 %v2225_v3  ;;  %v1478_v2 = vrot.slane %v1453_v22, %v2607_v9  ;;  %v1228_v16 = vld [vmem:[#allocation10 + $0x510] sm:$0xff]  ;;  %v1233_v17 = vld [vmem:[#allocation10 + $0x538] sm:$0xff]  ;;  %v1230_v22 = vld [vmem:[#allocation10 + $0x520] sm:$0xff] }
 0x18f   :  { %v1464_v21 = vrot.slane %v1452_v38, %v2607_v9  ;;  %v1397_v24 = vrot.slane %v1341_v54, %v2607_v9  ;;  %v2789_v11 = vrot.slane %v1340_v39, %v2607_v9  ;;  %2228 = vmatprep.subr.bf16.mxu0 %v2227_v5  ;;  %v2798_v0 = vrot.slane %v1457_v23, %v2607_v9  ;;  %v1232_v38 = vld [vmem:[#allocation10 + $0x530] sm:$0xff]  ;;  %v1235_v39 = vld [vmem:[#allocation10 + $0x548] sm:$0xff]  ;;  %v1237_v54 = vld [vmem:[#allocation10 + $0x558] sm:$0xff] }
 0x190   :  { %v2795_v20 = vrot.slane %v1455_v58, %v2607_v9  ;;  %v1471_v46 = vrot.slane %v1454_v8, %v2607_v9  ;;  %v1499_v47 = vrot.slane %v1451_v12, %v2607_v9  ;;  %v1517_v3 = vcombine.low %v1478_v2, %v1506_v56  ;;  %v1231_v12 = vld [vmem:[#allocation10 + $0x528] sm:$0xff]  ;;  %v1234_v23 = vld [vmem:[#allocation10 + $0x540] sm:$0xff]  ;;  %v1236_v8 = vld [vmem:[#allocation10 + $0x550] sm:$0xff] }
 0x191   :  { %v1518_v25 = vcombine.high %v1478_v2, %v1506_v56  ;;  %v1514_v26 = vcombine.low %v1464_v21, %v1492_v18  ;;  %v1515_v27 = vcombine.high %v1464_v21, %v1492_v18  ;;  %v1403_v29 = vcombine.low %v1369_v62, %v1397_v24  ;;  %v1229_v62 = vld [vmem:[#allocation10 + $0x518] sm:$0xff]  ;;  %v1239_v2 = vld [vmem:[#allocation10 + $0x568] sm:$0xff] }
 0x192   :  { %v1400_v50 = vcombine.low %v2776_v37, %v2789_v11  ;;  %v1519_v51 = vcombine.low %v2795_v20, %v2798_v0  ;;  %v2806_v5 = vcombine.low %v1471_v46, %v1499_v47  ;;  %1602 = vmatprep.mubr.f32.mxu1 %v1517_v3  ;;  %2230 = vmatpush1.bf16.msra.mxu0 %v2229_v63  ;;  %v1218_v63 = vld [vmem:[#allocation10 + $0x4c0] sm:$0xff]  ;;  %v1241_v21 = vld [vmem:[#allocation10 + $0x578] sm:$0xff]  ;;  %v1240_v3 = vld [vmem:[#allocation10 + $0x570] sm:$0xff] }
 0x193   :  { %1679 = vmatprep.mubr.f32.mxu0 %v1518_v25  ;;  %1603 = vmatmul.mubr.f32.gmra.mrb[14].mxu1 %v1514_v26  ;;  %v2237_v44 = vpack.c.bf16 %v1212_v40, %v1210_v36  ;;  %v2239_v1 = vpack.c.bf16 %v1217_v42, %v1215_v41  ;;  %v2241_v52 = vpack.c.bf16 %v1216_v45, %v1214_v43  ;;  %v1238_v47 = vld [vmem:[#allocation10 + $0x560] sm:$0xff]  ;;  %v1243_v25 = vld [vmem:[#allocation10 + $0x588] sm:$0xff]  ;;  %v1245_v26 = vld [vmem:[#allocation10 + $0x598] sm:$0xff] }
 0x194   :  { %1680 = vmatmul.mubr.f32.gmra.mrb[2].mxu0 %v1515_v27  ;;  %2232 = vmatprep.subr.bf16.mxu0 %v2231_v14  ;;  %v2243_v55 = vpack.c.bf16 %v1221_v49, %v1219_v48  ;;  %v1225_v14 = vld [vmem:[#allocation10 + $0x4f8] sm:$0xff]  ;;  %v2245_v6 = vpack.c.bf16 %v1220_v57, %v1218_v63  ;;  %v2249_v7 = vpack.c.bf16 %v1224_v53, %v1222_v28  ;;  %v1246_v36 = vld [vmem:[#allocation10 + $0x5a0] sm:$0xff]  ;;  %v1248_v40 = vld [vmem:[#allocation10 + $0x5b0] sm:$0xff] }
 0x195   :  { %1750 = vmatprep.mubr.f32.mxu0 %v1403_v29  ;;  %v2247_v60 = vpack.c.bf16 %v1225_v14, %v1223_v59  ;;  %v2251_v13 = vpack.c.bf16 %v1229_v62, %v1227_v61  ;;  %v2253_v18 = vpack.c.bf16 %v1228_v16, %v1226_v15  ;;  %v2255_v19 = vpack.c.bf16 %v1233_v17, %v1231_v12  ;;  %v1251_v41 = vld [vmem:[#allocation10 + $0x5c8] sm:$0xff]  ;;  %v1253_v42 = vld [vmem:[#allocation10 + $0x5d8] sm:$0xff]  ;;  %v1250_v43 = vld [vmem:[#allocation10 + $0x5c0] sm:$0xff] }
 0x196   :  { %2234 = vmatpush1.bf16.msra.mxu0 %v2233_v34  ;;  %v2257_v56 = vpack.c.bf16 %v1232_v38, %v1230_v22  ;;  %v2259_v58 = vpack.c.bf16 %v1237_v54, %v1235_v39  ;;  %v2261_v24 = vpack.c.bf16 %v1236_v8, %v1234_v23  ;;  %v2263_v46 = vpack.c.bf16 %v1241_v21, %v1239_v2  ;;  %v1252_v45 = vld [vmem:[#allocation10 + $0x5d0] sm:$0xff]  ;;  %v1255_v48 = vld [vmem:[#allocation10 + $0x5e8] sm:$0xff]  ;;  %v1257_v49 = vld [vmem:[#allocation10 + $0x5f8] sm:$0xff] }
 0x197   :  { %2236 = vmatprep.subr.bf16.mxu0 %v2235_v35  ;;  %v2265_v27 = vpack.c.bf16 %v1240_v3, %v1238_v47  ;;  %v2267_v29 = vpack.c.bf16 %v1245_v26, %v1243_v25  ;;  %v2269_v34 = vpack.c.bf16 %v1244_v31, %v1242_v30  ;;  %v2271_v35 = vpack.c.bf16 %v1249_v33, %v1247_v32  ;;  %v1254_v63 = vld [vmem:[#allocation10 + $0x5e0] sm:$0xff]  ;;  %v1256_v57 = vld [vmem:[#allocation10 + $0x5f0] sm:$0xff]  ;;  %v1258_v53 = vld [vmem:[%s2872_s6] sm:$0x3] }
 0x198   :  { %v2281_v59 = vpack.c.bf16 %v1256_v57, %v1254_v63  ;;  %v1266_v61 = vsub.s32 1, %v2604_v4  ;;  %v1263_v62 = vrot.slane %v1258_v53, %v2610_v10 }
 0x19a   :  { %2238 = vmatpush1.bf16.msra.mxu0 %v2237_v44  ;;  %v2273_v44 = vpack.c.bf16 %v1248_v40, %v1246_v36  ;;  %v1267_v37 = vrot.slane %v1258_v53, %v1266_v61 }
 0x19b   :  { %2240 = vmatprep.subr.bf16.mxu0 %v2239_v1  ;;  %v2275_v1 = vpack.c.bf16 %v1253_v42, %v1251_v41 }
 0x19e   :  { %2242 = vmatpush1.bf16.msra.mxu0 %v2241_v52  ;;  %v2277_v52 = vpack.c.bf16 %v1252_v45, %v1250_v43 }
 0x19f   :  { %2244 = vmatprep.subr.bf16.mxu0 %v2243_v55  ;;  %v2279_v55 = vpack.c.bf16 %v1257_v49, %v1255_v48 }
 0x1a2   :  { %2246 = vmatpush1.bf16.msra.mxu0 %v2245_v6 }
 0x1a3   :  { %2248 = vmatprep.subr.bf16.mxu0 %v2247_v60 }
 0x1a6   :  { %2250 = vmatpush1.bf16.msra.mxu0 %v2249_v7 }
 0x1a7   :  { %2252 = vmatprep.subr.bf16.mxu0 %v2251_v13 }
 0x1aa   :  { %2254 = vmatpush1.bf16.msra.mxu0 %v2253_v18 }
 0x1ab   :  { %2256 = vmatprep.subr.bf16.mxu0 %v2255_v19 }
 0x1ae   :  { %2258 = vmatpush1.bf16.msra.mxu0 %v2257_v56 }
 0x1af   :  { %2260 = vmatprep.subr.bf16.mxu0 %v2259_v58 }
 0x1b2   :  { %2262 = vmatpush1.bf16.msra.mxu0 %v2261_v24 }
 0x1b3   :  { %2264 = vmatprep.subr.bf16.mxu0 %v2263_v46 }
 0x1b6   :  { %2266 = vmatpush1.bf16.msra.mxu0 %v2265_v27 }
 0x1b7   :  { %2268 = vmatprep.subr.bf16.mxu0 %v2267_v29 }
 0x1ba   :  { %2270 = vmatpush1.bf16.msra.mxu0 %v2269_v34 }
 0x1bb   :  { %2272 = vmatprep.subr.bf16.mxu0 %v2271_v35 }
 0x1be   :  { %2274 = vmatpush1.bf16.msra.mxu0 %v2273_v44 }
 0x1bf   :  { %2276 = vmatprep.subr.bf16.mxu0 %v2275_v1 }
 0x1c2   :  { %2278 = vmatpush1.bf16.msra.mxu0 %v2277_v52 }
 0x1c3   :  { %2280 = vmatprep.subr.bf16.mxu0 %v2279_v55 }
 0x1c6   :  { %2282 = vmatpush1.bf16.msra.mxu0 %v2281_v59 }
 0x1c9   :  { %1751 = vmatmul.mubr.f32.vlgmr.msra.gmra.mrb[0].mxu0 %v1400_v50 }
 0x1ca   :  { %1756 = vmatprep.mubr.f32.mxu0 %v1519_v51 }
 0x1cd   :  { %1757 = vmatmul.mubr.f32.gmra.mrb[2].mxu0 %v2806_v5 }
 0x25c   :  { %v1598_v14 = vpop.f32.mrb[12].mxu1 }
 0x25d   :  { %v1600_v6 = vpop.f32.mrb[13].mxu1  ;;  %v1599_v11 = vadd.f32 %v1598_v14, %v1263_v62 }
 0x25e   :  { %v1601_v50 = vadd.f32 %v1600_v6, %v1267_v37 }
 0x266   :  { %v1604_v60 = vpop.f32.mrb[14].mxu1 }
 0x267   :  { %v1606_v28 = vpop.f32.mrb[15].mxu1  ;;  %v1605_v5 = vadd.f32 %v1604_v60, %v1263_v62 }
 0x268   :  { %v1607_v15 = vadd.f32 %v1606_v28, %v1267_v37 }
 0x29c   :  { %v1752_v7 = vpop.f32.mrb[0].mxu0 }
 0x29d   :  { %v2284_v20 = vadd.f32 %v1752_v7, %v1599_v11  ;;  %v1754_v0 = vpop.f32.mrb[1].mxu0 }
 0x29e   :  { %v2286_v51 = vadd.f32 %v1754_v0, %v1601_v50 }
 0x29f   :  { %v2062_v13 = vmul.f32 -1.442695, %v2284_v20 }
 0x2a0   :  { %v2063_v16 = vmul.f32 -1.442695, %v2286_v51  ;;  %v1758_v12 = vpop.f32.mrb[2].mxu0 }
 0x2a1   :  { %2311 = vpow2.f32 %v2062_v13  ;;  %v2288_v17 = vadd.f32 %v1758_v12, %v1605_v5  ;;  %v1760_v18 = vpop.f32.mrb[3].mxu0 }
 0x2a2   :  { %2313 = vpow2.f32 %v2063_v16  ;;  %v2290_v19 = vadd.f32 %v1760_v18, %v1607_v15 }
 0x2a3   :  { %v2064_v4 = vmul.f32 -1.442695, %v2288_v17 }
 0x2a4   :  { %v2065_v22 = vmul.f32 -1.442695, %v2290_v19 }
 0x2a5   :  { %2315 = vpow2.f32 %v2064_v4 }
 0x2a6   :  { %2317 = vpow2.f32 %v2065_v22 }
 0x2ab   :  { %v2312_v10 = vpop.eup %2311 }
 0x2ac   :  { %v2314_v38 = vpop.eup %2313  ;;  %v1775_v39 = vadd.f32 1.0, %v2312_v10 }
 0x2ad   :  { %v1776_v54 = vadd.f32 1.0, %v2314_v38 }
 0x2ae   :  { %2319 = vrcp.f32 %v1775_v39 }
 0x2af   :  { %v2316_v56 = vpop.eup %2315  ;;  %2321 = vrcp.f32 %v1776_v54 }
 0x2b0   :  { %v2318_v58 = vpop.eup %2317  ;;  %v1777_v23 = vadd.f32 1.0, %v2316_v56 }
 0x2b1   :  { %v1778_v8 = vadd.f32 1.0, %v2318_v58 }
 0x2b2   :  { %2323 = vrcp.f32 %v1777_v23 }
 0x2b3   :  { %2325 = vrcp.f32 %v1778_v8 }
 0x2b8   :  { %v2320_v2 = vpop.eup %2319 }
 0x2b9   :  { %v2322_v21 = vpop.eup %2321  ;;  %v1787_v24 = vmul.f32 %v2320_v2, %v2284_v20 }
 0x2ba   :  { %v1788_v46 = vmul.f32 %v2322_v21, %v2286_v51 }
 0x2bc   :  { %v2324_v47 = vpop.eup %2323  ;;  %v1795_v3 = vcombine.low %v1787_v24, %v1788_v46  ;;  %v1796_v25 = vcombine.high %v1787_v24, %v1788_v46 }
 0x2bd   :  { %v2326_v26 = vpop.eup %2325  ;;  %v1789_v27 = vmul.f32 %v2324_v47, %v2288_v17 }
 0x2be   :  { %v1803_v29 = vrot.slane %v1795_v3, %v2607_v9  ;;  %v1810_v30 = vrot.slane %v1796_v25, %v2607_v9  ;;  %v1790_v31 = vmul.f32 %v2326_v26, %v2290_v19 }
 0x2c0   :  { %v1811_v32 = vcombine.high %v1803_v29, %v1803_v29  ;;  %v1812_v33 = vcombine.high %v1810_v30, %v1810_v30  ;;  %v1826_v34 = vrot.slane %v1810_v30, %v2607_v9  ;;  %v1845_v35 = vcombine.low %v1789_v27, %v1790_v31 }
 0x2c1   :  { %v1846_v36 = vcombine.high %v1789_v27, %v1790_v31  ;;  %v1819_v40 = vrot.slane %v1803_v29, %v2607_v9 }
 0x2c2   :  { %v1833_v41 = vrot.slane %v1811_v32, %v2607_v9  ;;  %v1840_v42 = vrot.slane %v1812_v33, %v2607_v9  ;;  %v1842_v44 = vcombine.high %v1826_v34, %v1826_v34  ;;  %v1853_v1 = vrot.slane %v1845_v35, %v2607_v9 }
 0x2c3   :  { %v1860_v43 = vrot.slane %v1846_v36, %v2607_v9 }
 0x2c4   :  { %v1893_v45 = vcombine.low %v1819_v40, %v1833_v41  ;;  %v2066_v48 = vcombine.high %v1819_v40, %v1833_v41  ;;  %v1895_v49 = vcombine.low %v1826_v34, %v1840_v42  ;;  %v1844_v52 = vcombine.high %v1840_v42, %v1840_v42 }
 0x2c5   :  { %v1861_v55 = vcombine.high %v1853_v1, %v1853_v1  ;;  %v1862_v63 = vcombine.high %v1860_v43, %v1860_v43  ;;  %v1869_v57 = vrot.slane %v1853_v1, %v2607_v9  ;;  %v1923_v60 = vrot.slane %v1842_v44, %v2607_v9 }
 0x2c6   :  { %v1902_v59 = vrot.slane %v1893_v45, %v2607_v9  ;;  %v1909_v14 = vrot.slane %v2066_v48, %v2607_v9  ;;  %v1916_v6 = vrot.slane %v1895_v49, %v2607_v9  ;;  %v1876_v7 = vrot.slane %v1860_v43, %v2607_v9 }
 0x2c7   :  { %v1883_v28 = vrot.slane %v1861_v55, %v2607_v9  ;;  %v1891_v53 = vcombine.high %v1869_v57, %v1869_v57  ;;  %v1958_v61 = vcombine.low %v1844_v52, %v1869_v57  ;;  %v1890_v20 = vrot.slane %v1862_v63, %v2607_v9 }
 0x2c8   :  { %v1924_v62 = vcombine.low %v1902_v59, %v1909_v14  ;;  %v1925_v37 = vcombine.high %v1902_v59, %v1909_v14  ;;  %v1926_v11 = vcombine.low %v1916_v6, %v1923_v60  ;;  %v1927_v50 = vcombine.high %v1916_v6, %v1923_v60 }
 0x2c9   :  { %v1892_v0 = vcombine.high %v1883_v28, %v1883_v28  ;;  %v1959_v51 = vcombine.low %v1883_v28, %v1891_v53  ;;  %v1967_v17 = vrot.slane %v1958_v61, %v2607_v9  ;;  %v1988_v10 = vrot.slane %v1890_v20, %v2607_v9 }
 0x2ca   :  { %v1934_v5 = vrot.slane %v1924_v62, %v2607_v9  ;;  %v1941_v13 = vrot.slane %v1925_v37, %v2607_v9  ;;  %v1948_v15 = vrot.slane %v1926_v11, %v2607_v9  ;;  %v1955_v16 = vrot.slane %v1927_v50, %v2607_v9 }
 0x2cb   :  { %v1960_v12 = vcombine.low %v1892_v0, %v1876_v7  ;;  %v1974_v18 = vrot.slane %v1959_v51, %v2607_v9 }
 0x2cc   :  { %v1956_v19 = vcombine.low %v1934_v5, %v1948_v15  ;;  %v1957_v4 = vcombine.low %v1941_v13, %v1955_v16 }
 0x2cd   :  { %v1981_v22 = vrot.slane %v1960_v12, %v2607_v9  ;;  %v1989_v38 = vcombine.low %v1967_v17, %v1974_v18  ;;  %v1990_v39 = vcombine.high %v1967_v17, %v1974_v18 }
 0x2ce   :  { %2027 = vst [vmem:[%s2873_s7] sm:$0x7f] %v1956_v19  ;;  %2028 = vst [vmem:[%s2873_s7 + $0x8] sm:$0x7f] %v1957_v4 }
 0x2cf   :  { %v1991_v54 = vcombine.low %v1981_v22, %v1988_v10  ;;  %v1992_v56 = vcombine.high %v1981_v22, %v1988_v10  ;;  %v1999_v58 = vrot.slane %v1989_v38, %v2607_v9  ;;  %v2006_v23 = vrot.slane %v1990_v39, %v2607_v9 }
 0x2d1   :  { %v2013_v8 = vrot.slane %v1991_v54, %v2607_v9  ;;  %v2020_v2 = vrot.slane %v1992_v56, %v2607_v9 }
 0x2d3   :  { %v2021_v21 = vcombine.low %v1999_v58, %v2013_v8  ;;  %v2022_v24 = vcombine.low %v2006_v23, %v2020_v2 }
 0x2d5   :  { %2029 = vst [vmem:[%s2873_s7 + $0x10] sm:$0x7f] %v2021_v21  ;;  %2030 = vst [vmem:[%s2873_s7 + $0x18] sm:$0x7f] %v2022_v24 }
 0x2d6   :  { %2035 = vsyncpa [#allocation3], 1 }
 0x2d7   :  { %2036 = vsyncpa [#allocation5], 1 }
 0x2d8   :  { %2037 = vsyncpa [#allocation8], 1 }
 0x2d9   :  { %2038 = vsyncpa [#allocation11], 1 }

</bundles_post_ra>
